<compile_context>
chip_gen: v6e
topology: v6e:2x2x1
jax: 0.10.0
libtpu: 0.0.40
codegen_flags: <defaults>
</compile_context>

<pallas_src>
import math
from typing import NamedTuple

import jax
import jax.numpy as jnp
from jax import lax
from jax.experimental import pallas as pl
from jax.experimental.pallas import tpu as pltpu


# =============================================================================
# Raster settings (mirrors GaussianRasterizationSettings fields that matter)
# =============================================================================
class GaussianRasterizationSettings(NamedTuple):
    image_height: int
    image_width: int
    tanfovx: float
    tanfovy: float
    bg: jnp.ndarray            # (3,)
    scale_modifier: float
    viewmatrix: jnp.ndarray    # (4,4), row-vector convention: p_cam = [p,1] @ V
    projmatrix: jnp.ndarray    # (4,4), full projection, row-vector convention
    sh_degree: int
    campos: jnp.ndarray        # (3,)
    prefiltered: bool
    debug: bool
    use_hwc: bool
    use_train_speedup: bool
    lambda_dssim: float
    ignored_rate: float


def _round_up(x: int, m: int) -> int:
    return (x + m - 1) // m * m


# =============================================================================
# Pallas kernel 1: tiled per-pixel alpha compositing of depth-sorted gaussians
# =============================================================================
# Gaussian table rows (f32), chunked as (num_chunks, NROWS, CHUNK):
NROWS = 16
ROW_MX, ROW_MY = 0, 1
ROW_CA, ROW_CB, ROW_CC = 2, 3, 4
ROW_OP = 5
ROW_R, ROW_G, ROW_B = 6, 7, 8
ROW_XMIN, ROW_XMAX, ROW_YMIN, ROW_YMAX = 9, 10, 11, 12
# rows 13..15 unused padding

GAUSS_CHUNK = 256      # gaussians per SMEM chunk (2 x 16 x 256 f32 = 32 KiB SMEM)
RASTER_TH = 16         # pixel tile rows   (multiple of 8)
RASTER_TW = 128        # pixel tile lanes  (multiple of 128 -> unmasked vst)
GAUSS_UNROLL = 4       # manual unroll of the per-gaussian loop


def _make_raster_kernel(num_chunks: int, chunk: int, th: int, tw: int,
                        unroll: int):
    assert chunk % unroll == 0

    def kernel(table_hbm, color_ref, trans_ref,
               tab_smem, copy_sem, t_ref, cr_ref, cg_ref, cb_ref, live_ref):
        ti = pl.program_id(0)
        tj = pl.program_id(1)
        y0 = (ti * th).astype(jnp.float32)
        x0 = (tj * tw).astype(jnp.float32)
        y_hi = y0 + float(th - 1)
        x_hi = x0 + float(tw - 1)
        ys = y0 + lax.broadcasted_iota(jnp.int32, (th, tw), 0).astype(jnp.float32)
        xs = x0 + lax.broadcasted_iota(jnp.int32, (th, tw), 1).astype(jnp.float32)

        # per-tile accumulator init
        t_ref[...] = jnp.ones((th, tw), jnp.float32)
        cr_ref[...] = jnp.zeros((th, tw), jnp.float32)
        cg_ref[...] = jnp.zeros((th, tw), jnp.float32)
        cb_ref[...] = jnp.zeros((th, tw), jnp.float32)
        live_ref[...] = jnp.ones((th, tw), jnp.float32)

        # ---- double-buffered HBM -> SMEM table chunk delivery --------------
        def start_copy(k, slot):
            pltpu.make_async_copy(table_hbm.at[k], tab_smem.at[slot],
                                  copy_sem.at[slot]).start()

        def wait_copy(slot):
            pltpu.make_async_copy(table_hbm.at[0], tab_smem.at[slot],
                                  copy_sem.at[slot]).wait()

        start_copy(0, 0)

        def chunk_body(k, carry):
            slot = k & 1
            wait_copy(slot)

            @pl.when(k + 1 < num_chunks)
            def _():
                start_copy(k + 1, 1 - slot)

            def gauss_group(blk, c2):
                for u in range(unroll):
                    i = blk * unroll + u
                    # scalar per-tile cull: gaussian bbox vs. tile bounds
                    gx_min = tab_smem[slot, ROW_XMIN, i]
                    gx_max = tab_smem[slot, ROW_XMAX, i]
                    gy_min = tab_smem[slot, ROW_YMIN, i]
                    gy_max = tab_smem[slot, ROW_YMAX, i]
                    hit = ((gx_max >= x0) & (gx_min <= x_hi) &
                           (gy_max >= y0) & (gy_min <= y_hi))

                    @pl.when(hit)
                    def _():
                        mx = tab_smem[slot, ROW_MX, i]
                        my = tab_smem[slot, ROW_MY, i]
                        ca = tab_smem[slot, ROW_CA, i]
                        cbn = tab_smem[slot, ROW_CB, i]
                        cc = tab_smem[slot, ROW_CC, i]
                        op = tab_smem[slot, ROW_OP, i]
                        col_r = tab_smem[slot, ROW_R, i]
                        col_g = tab_smem[slot, ROW_G, i]
                        col_b = tab_smem[slot, ROW_B, i]

                        dx = xs - mx
                        dy = ys - my
                        power = (-0.5 * (ca * dx * dx + cc * dy * dy)
                                 - cbn * dx * dy)
                        a = jnp.minimum(0.99, op * jnp.exp(power))
                        keep = (power <= 0.0) & (a >= (1.0 / 255.0))

                        T = t_ref[...]
                        live = live_ref[...]
                        test_T = T * (1.0 - a)
                        ok = test_T >= 1e-4
                        contrib = keep & ok & (live > 0.0)
                        w = jnp.where(contrib, a * T, 0.0)
                        cr_ref[...] += col_r * w
                        cg_ref[...] += col_g * w
                        cb_ref[...] += col_b * w
                        t_ref[...] = jnp.where(contrib, test_T, T)
                        live_ref[...] = jnp.where(
                            keep & jnp.logical_not(ok), 0.0, live)
                return c2

            lax.fori_loop(0, chunk // unroll, gauss_group, 0)
            return carry

        lax.fori_loop(0, num_chunks, chunk_body, 0)

        # lane-dense finalize: one store per output plane per tile
        color_ref[0, :, :] = cr_ref[...]
        color_ref[1, :, :] = cg_ref[...]
        color_ref[2, :, :] = cb_ref[...]
        trans_ref[...] = t_ref[...]

    return kernel


def _rasterize_pallas(table_chunks, height, width,
                      *, th=RASTER_TH, tw=RASTER_TW, unroll=GAUSS_UNROLL):
    num_chunks, nrows, chunk = table_chunks.shape
    assert nrows == NROWS
    hp = _round_up(height, th)
    wp = _round_up(width, tw)
    grid = (hp // th, wp // tw)
    num_g = num_chunks * chunk

    kernel = _make_raster_kernel(num_chunks, chunk, th, tw, unroll)
    cost = pl.CostEstimate(
        flops=int(35 * hp * wp * num_g),
        transcendentals=int(hp * wp * num_g),
        bytes_accessed=int(table_chunks.size * 4 + 4 * hp * wp * 4))

    color, trans = pl.pallas_call(
        kernel,
        out_shape=(jax.ShapeDtypeStruct((3, hp, wp), jnp.float32),
                   jax.ShapeDtypeStruct((hp, wp), jnp.float32)),
        grid_spec=pltpu.PrefetchScalarGridSpec(
            num_scalar_prefetch=0,
            grid=grid,
            in_specs=[pl.BlockSpec(memory_space=pl.ANY)],   # table stays in HBM
            out_specs=(
                pl.BlockSpec((3, th, tw), lambda i, j: (0, i, j)),
                pl.BlockSpec((th, tw), lambda i, j: (i, j)),
            ),
            scratch_shapes=[
                pltpu.SMEM((2, NROWS, chunk), jnp.float32),  # 2 table buffers
                pltpu.SemaphoreType.DMA((2,)),
                pltpu.VMEM((th, tw), jnp.float32),  # T
                pltpu.VMEM((th, tw), jnp.float32),  # r
                pltpu.VMEM((th, tw), jnp.float32),  # g
                pltpu.VMEM((th, tw), jnp.float32),  # b
                pltpu.VMEM((th, tw), jnp.float32),  # live (sticky "done" flag)
            ]),
        compiler_params=pltpu.CompilerParams(
            dimension_semantics=("parallel", "parallel")),
        cost_estimate=cost,
    )(table_chunks)
    return color, trans


# =============================================================================
# Pallas kernel 2: cal_loss hot path (L1 + 11x11 Gaussian SSIM).  The
# separable blur is done as two small banded matmuls on the MXU.
# =============================================================================
def _gaussian_window_1d(window_size: int, sigma: float):
    g = [math.exp(-((x - window_size // 2) ** 2) / float(2 * sigma ** 2))
         for x in range(window_size)]
    s = sum(g)
    return [v / s for v in g]


def _band_matrix(n_in: int, n_out: int, taps):
    # M[j, x] = taps[j - x] if 0 <= j - x < len(taps) else 0
    taps_a = jnp.asarray(taps, jnp.float32)
    j = jnp.arange(n_in)[:, None]
    x = jnp.arange(n_out)[None, :]
    d = j - x
    valid = (d >= 0) & (d < len(taps))
    return jnp.where(valid, taps_a[jnp.clip(d, 0, len(taps) - 1)],
                     0.0).astype(jnp.float32)


def _make_loss_kernel(th, tw, pad, lambda_dssim):
    c1 = 0.01 ** 2
    c2 = 0.03 ** 2
    sr = th + 2 * pad
    sc = tw + 2 * pad

    def kernel(wh_ref, wv_ref, img1_hbm, img2_hbm, out_ref, slab1, slab2, sem):
        i = pl.program_id(0)
        j = pl.program_id(1)
        row0 = pl.multiple_of(i * th, th)
        col0 = pl.multiple_of(j * tw, tw)
        cp1 = pltpu.make_async_copy(
            img1_hbm.at[:, pl.ds(row0, sr), pl.ds(col0, sc)], slab1, sem.at[0])
        cp2 = pltpu.make_async_copy(
            img2_hbm.at[:, pl.ds(row0, sr), pl.ds(col0, sc)], slab2, sem.at[1])
        cp1.start()
        cp2.start()
        cp1.wait()
        cp2.wait()

        wh = wh_ref[...]   # (sc, tw)  horizontal band matrix
        wv = wv_ref[...]   # (th, sr)  vertical band matrix

        acc = jnp.zeros((th, tw), jnp.float32)
        for c in range(3):
            a = slab1[c]   # (sr, sc)
            b = slab2[c]

            def blur(x):
                hx = jnp.dot(x, wh, preferred_element_type=jnp.float32)
                return jnp.dot(wv, hx, preferred_element_type=jnp.float32)

            mu1 = blur(a)
            mu2 = blur(b)
            s11 = blur(a * a)
            s22 = blur(b * b)
            s12 = blur(a * b)

            mu1_sq = mu1 * mu1
            mu2_sq = mu2 * mu2
            mu1_mu2 = mu1 * mu2
            sigma1_sq = s11 - mu1_sq
            sigma2_sq = s22 - mu2_sq
            sigma12 = s12 - mu1_mu2
            ssim_map = ((2.0 * mu1_mu2 + c1) * (2.0 * sigma12 + c2)) / (
                (mu1_sq + mu2_sq + c1) * (sigma1_sq + sigma2_sq + c2))

            av = a[pad:pad + th, pad:pad + tw]
            bv = b[pad:pad + th, pad:pad + tw]
            l1 = jnp.abs(av - bv)
            acc = acc + ((1.0 - lambda_dssim) * l1
                         + lambda_dssim * (1.0 - ssim_map))

        out_ref[...] = acc * (1.0 / 3.0)

    return kernel


def cal_loss_pallas(image, gt_image, lambda_dssim, window_size=11):
    # image, gt_image: (3, H, W) float32
    _, H, W = image.shape
    pad = window_size // 2
    g1d = _gaussian_window_1d(window_size, 1.5)

    tw = 128
    th = min(64, _round_up(H, 8))
    hp = _round_up(H, th)
    wp = _round_up(W, tw)
    sr = th + 2 * pad
    sc = tw + 2 * pad

    def pad_img(img):
        # zero-pad like conv2d(padding=5); extra right/bottom padding is
        # sliced off at the end.
        buf = jnp.zeros((3, hp + 2 * pad, wp + 2 * pad), jnp.float32)
        return buf.at[:, pad:pad + H, pad:pad + W].set(img.astype(jnp.float32))

    img1p = pad_img(image)
    img2p = pad_img(gt_image)
    wh = _band_matrix(sc, tw, g1d)      # (sc, tw)
    wv = _band_matrix(sr, th, g1d).T    # (th, sr)

    kernel = _make_loss_kernel(th, tw, pad, float(lambda_dssim))
    loss = pl.pallas_call(
        kernel,
        out_shape=jax.ShapeDtypeStruct((hp, wp), jnp.float32),
        grid_spec=pltpu.PrefetchScalarGridSpec(
            num_scalar_prefetch=0,
            grid=(hp // th, wp // tw),
            in_specs=[
                pl.BlockSpec((sc, tw), lambda i, j: (0, 0)),
                pl.BlockSpec((th, sr), lambda i, j: (0, 0)),
                pl.BlockSpec(memory_space=pl.ANY),
                pl.BlockSpec(memory_space=pl.ANY),
            ],
            out_specs=pl.BlockSpec((th, tw), lambda i, j: (i, j)),
            scratch_shapes=[
                pltpu.VMEM((3, sr, sc), jnp.float32),
                pltpu.VMEM((3, sr, sc), jnp.float32),
                pltpu.SemaphoreType.DMA((2,)),
            ]),
        compiler_params=pltpu.CompilerParams(
            dimension_semantics=("parallel", "parallel")),
    )(wh, wv, img1p, img2p)
    return loss[:H, :W]


def get_ignored_tiles(loss, ignored_rate: float, block: int = 16):
    # plain-JAX glue (argsort has no clean Pallas equivalent).
    # Matches the torch reference exactly, including the strict '<' threshold.
    assert ignored_rate > 0
    h, w = loss.shape
    hb = (h + block - 1) // block
    wb = (w + block - 1) // block
    new_loss = jnp.zeros((hb * block, wb * block), jnp.float32).at[:h, :w].set(loss)
    new_loss = new_loss.reshape(hb, block, wb, block).transpose(0, 2, 1, 3)
    new_loss = new_loss.reshape(hb * wb, -1)
    new_loss = jnp.mean(new_loss, axis=-1)
    idxs = jnp.argsort(new_loss)
    n = int(hb * wb * ignored_rate)
    n = min(n, hb * wb - 1)
    limit = new_loss[idxs[n]]
    return (new_loss < limit).astype(jnp.int32)


# =============================================================================
# Per-gaussian projection / covariance setup (cheap O(P) glue, plain JAX)
# =============================================================================
def _quat_to_rot(q):
    q = q / jnp.linalg.norm(q, axis=-1, keepdims=True)
    r, x, y, z = q[:, 0], q[:, 1], q[:, 2], q[:, 3]
    R = jnp.stack([
        jnp.stack([1 - 2 * (y * y + z * z), 2 * (x * y - r * z), 2 * (x * z + r * y)], -1),
        jnp.stack([2 * (x * y + r * z), 1 - 2 * (x * x + z * z), 2 * (y * z - r * x)], -1),
        jnp.stack([2 * (x * z - r * y), 2 * (y * z + r * x), 1 - 2 * (x * x + y * y)], -1),
    ], axis=-2)
    return R  # (P, 3, 3)


def _project_gaussians(means3D, scales, rotations, opacities, colors, s,
                       chunk=GAUSS_CHUNK):
    P = means3D.shape[0]
    H, W = s.image_height, s.image_width
    ones = jnp.ones((P, 1), jnp.float32)
    homog = jnp.concatenate([means3D, ones], axis=1)
    p_cam = homog @ s.viewmatrix               # (P,4)
    depth = p_cam[:, 2]
    p_hom = homog @ s.projmatrix
    p_w = 1.0 / (p_hom[:, 3:4] + 1e-7)
    p_proj = p_hom[:, :3] * p_w

    R = _quat_to_rot(rotations)
    sc = s.scale_modifier * scales
    M = R * sc[:, None, :]
    Sigma = M @ jnp.swapaxes(M, 1, 2)          # (P,3,3) world-space covariance

    focal_x = W / (2.0 * s.tanfovx)
    focal_y = H / (2.0 * s.tanfovy)
    tz = depth
    limx, limy = 1.3 * s.tanfovx, 1.3 * s.tanfovy
    tx = jnp.clip(p_cam[:, 0] / tz, -limx, limx) * tz
    ty = jnp.clip(p_cam[:, 1] / tz, -limy, limy) * tz
    zeros = jnp.zeros_like(tz)
    J = jnp.stack([
        jnp.stack([focal_x / tz, zeros, -focal_x * tx / (tz * tz)], -1),
        jnp.stack([zeros, focal_y / tz, -focal_y * ty / (tz * tz)], -1),
    ], axis=-2)                                 # (P,2,3)
    Wrot = s.viewmatrix[:3, :3].T
    Tm = J @ Wrot[None]
    cov2d = Tm @ Sigma @ jnp.swapaxes(Tm, 1, 2)
    c00 = cov2d[:, 0, 0] + 0.3
    c01 = cov2d[:, 0, 1]
    c11 = cov2d[:, 1, 1] + 0.3
    det = c00 * c11 - c01 * c01
    det_inv = 1.0 / jnp.where(det == 0, 1.0, det)
    conic_a = c11 * det_inv
    conic_b = -c01 * det_inv
    conic_c = c00 * det_inv

    mid = 0.5 * (c00 + c11)
    lam1 = mid + jnp.sqrt(jnp.maximum(0.1, mid * mid - det))
    lam2 = mid - jnp.sqrt(jnp.maximum(0.1, mid * mid - det))
    radius_f = jnp.ceil(3.0 * jnp.sqrt(jnp.maximum(lam1, lam2)))

    px = ((p_proj[:, 0] + 1.0) * W - 1.0) * 0.5
    py = ((p_proj[:, 1] + 1.0) * H - 1.0) * 0.5
    valid = (depth > 0.2) & (det > 0)
    radii = jnp.where(valid, radius_f, 0.0).astype(jnp.int32)

    # per-gaussian screen-space bbox for per-tile culling (empty if invalid)
    big = jnp.float32(1e9)
    r_eff = jnp.where(valid, radius_f, 0.0)
    bxmin = jnp.where(valid, px - r_eff, big)
    bxmax = jnp.where(valid, px + r_eff, -big)
    bymin = jnp.where(valid, py - r_eff, big)
    bymax = jnp.where(valid, py + r_eff, -big)

    # front-to-back depth ordering (invalid gaussians go last)
    order = jnp.argsort(jnp.where(valid, depth, jnp.inf))
    zero_row = jnp.zeros_like(px)
    rows = jnp.stack([px, py, conic_a, conic_b, conic_c,
                      opacities[:, 0], colors[:, 0], colors[:, 1], colors[:, 2],
                      bxmin, bxmax, bymin, bymax,
                      zero_row, zero_row, zero_row], axis=0)   # (NROWS, P)
    rows = rows[:, order].astype(jnp.float32)

    # pad to a whole number of chunks with "empty" gaussians (never hit).
    p_pad = _round_up(max(P, 1), chunk)
    pad_cols = p_pad - P
    if pad_cols:
        pad_block = jnp.zeros((NROWS, pad_cols), jnp.float32)
        pad_block = (pad_block.at[ROW_XMIN].set(big).at[ROW_XMAX].set(-big)
                     .at[ROW_YMIN].set(big).at[ROW_YMAX].set(-big))
        rows = jnp.concatenate([rows, pad_block], axis=1)

    table_chunks = rows.reshape(NROWS, p_pad // chunk, chunk).transpose(1, 0, 2)
    return table_chunks, radii


# =============================================================================
# GaussianRasterizer (forward only)
# =============================================================================
class GaussianRasterizer:
    def __init__(self, raster_settings: GaussianRasterizationSettings):
        self.raster_settings = raster_settings
        self.last_ignored_tiles = None

    def __call__(self, means3D, means2D, opacities, gt_image, shs=None,
                 colors_precomp=None, scales=None, rotations=None,
                 cov3D_precomp=None, top_k=1, pix_loss=None,
                 sparse_shs_degree=None, extract_gs_info=False, reg_loss_k=-1,
                 in_gs_info=None, extract_gs_rays_num=False, max_gs_num=-1,
                 gs_radius=3.0):
        s = self.raster_settings
        if (shs is None and colors_precomp is None) or \
           (shs is not None and colors_precomp is not None):
            raise Exception('Please provide excatly one of either SHs or precomputed colors!')
        if ((scales is None or rotations is None) and cov3D_precomp is None) or \
           ((scales is not None or rotations is not None) and cov3D_precomp is not None):
            raise Exception('Please provide exactly one of either scale/rotation pair or precomputed 3D covariance!')
        if colors_precomp is None:
            # TODO(synk): spherical-harmonics color evaluation not ported; use colors_precomp.
            raise NotImplementedError("SH color path not implemented; pass colors_precomp.")
        if cov3D_precomp is not None:
            # TODO(synk): precomputed 3D covariance path not ported; use scales/rotations.
            raise NotImplementedError("cov3D_precomp path not implemented.")

        H, W = s.image_height, s.image_width
        table_chunks, radii = _project_gaussians(
            means3D, scales, rotations, opacities, colors_precomp, s)
        # TODO(synk): for very large P, add CUDA-style per-tile gaussian binning
        # (scalar-prefetched per-tile index lists) instead of scalar bbox culling.
        color_acc, trans = _rasterize_pallas(table_chunks, H, W)
        bg = jnp.asarray(s.bg, jnp.float32)
        color = color_acc[:, :H, :W] + trans[None, :H, :W] * bg[:, None, None]

        if s.use_train_speedup:
            # TODO(synk): could fuse rasterization + loss per pixel tile to save
            # one HBM round trip of the rendered image.
            loss_map = cal_loss_pallas(color, gt_image, s.lambda_dssim)
            self.last_ignored_tiles = get_ignored_tiles(
                loss_map, ignored_rate=s.ignored_rate, block=16)
        else:
            self.last_ignored_tiles = jnp.zeros([1], jnp.int32)

        P = means3D.shape[0]
        # TODO(synk): auxiliary CUDA-op outputs (max-weight ids, gs-info, reg
        # loss, loss weights, ray counts, gs weights) are opaque to the binary
        # rasterizer; returned as zero placeholders with matching rank.
        max_weight_pids = jnp.zeros((top_k, H, W), jnp.int32)
        out_gs_info = jnp.zeros((0,), jnp.float32)
        out_reg_loss = jnp.zeros((H, W), jnp.float32)
        out_loss_weight = jnp.zeros((P,), jnp.float32)
        out_rays_num = jnp.zeros((P,), jnp.int32)
        out_gs_weight = jnp.zeros((P,), jnp.float32)
        return (color, radii, max_weight_pids, out_gs_info, out_reg_loss,
                out_loss_weight, out_rays_num, out_gs_weight)


# =============================================================================
# main
# =============================================================================
if __name__ == "__main__":
    key = jax.random.PRNGKey(0)
    P, H, W = 64, 32, 32
    tanfovx = tanfovy = 1.0
    znear, zfar = 0.01, 100.0

    k1, k2, k3, k4, k5, k6 = jax.random.split(key, 6)
    means3D = jnp.concatenate(
        [jax.random.uniform(k1, (P, 2), minval=-2.0, maxval=2.0),
         jax.random.uniform(k2, (P, 1), minval=3.0, maxval=6.0)], axis=1)
    scales = jax.random.uniform(k3, (P, 3), minval=0.05, maxval=0.3)
    rotations = jax.random.normal(k4, (P, 4))
    opacities = jax.random.uniform(k5, (P, 1), minval=0.3, maxval=0.9)
    colors_precomp = jax.random.uniform(k6, (P, 3), minval=0.0, maxval=1.0)
    gt_image = jax.random.uniform(jax.random.PRNGKey(1), (3, H, W))
    means2D = jnp.zeros((P, 3), jnp.float32)   # gradient placeholder, unused

    viewmatrix = jnp.eye(4, dtype=jnp.float32)
    proj = jnp.array([[1.0 / tanfovx, 0.0, 0.0, 0.0],
                      [0.0, 1.0 / tanfovy, 0.0, 0.0],
                      [0.0, 0.0, zfar / (zfar - znear), 1.0],
                      [0.0, 0.0, -zfar * znear / (zfar - znear), 0.0]],
                     dtype=jnp.float32)
    projmatrix = viewmatrix @ proj

    settings = GaussianRasterizationSettings(
        image_height=H, image_width=W, tanfovx=tanfovx, tanfovy=tanfovy,
        bg=jnp.array([0.1, 0.2, 0.3], jnp.float32), scale_modifier=1.0,
        viewmatrix=viewmatrix, projmatrix=projmatrix, sh_degree=0,
        campos=jnp.zeros((3,), jnp.float32), prefiltered=False, debug=False,
        use_hwc=False, use_train_speedup=True, lambda_dssim=0.2,
        ignored_rate=0.25)

    rasterizer = GaussianRasterizer(settings)
    outputs = rasterizer(means3D, means2D, opacities, gt_image,
                         colors_precomp=colors_precomp,
                         scales=scales, rotations=rotations)
    color, radii = outputs[0], outputs[1]
    jax.block_until_ready(color)
    jax.block_until_ready(radii)
    jax.block_until_ready(rasterizer.last_ignored_tiles)
    assert color.shape == (3, H, W) and radii.shape == (P,)
    assert bool(jnp.all(jnp.isfinite(color)))
    assert rasterizer.last_ignored_tiles.shape == (
        ((H + 15) // 16) * ((W + 15) // 16),)
    print("KERNEL_OK")
</pallas_src>

<mosaic_0001>
module attributes {stable_mosaic.version = 11 : i64} {
  func.func @kernel(%arg0: i32, %arg1: i32, %arg2: memref<1x16x256xf32, #tpu.memory_space<any>>, %arg3: memref<3x16x128xf32, #tpu.memory_space<vmem>>, %arg4: memref<16x128xf32, #tpu.memory_space<vmem>>, %arg5: memref<2x16x256xf32, #tpu.memory_space<smem>>, %arg6: memref<2x!tpu.dma_semaphore, #tpu.memory_space<semaphore_mem>>, %arg7: memref<16x128xf32, #tpu.memory_space<vmem>>, %arg8: memref<16x128xf32, #tpu.memory_space<vmem>>, %arg9: memref<16x128xf32, #tpu.memory_space<vmem>>, %arg10: memref<16x128xf32, #tpu.memory_space<vmem>>, %arg11: memref<16x128xf32, #tpu.memory_space<vmem>>) attributes {dimension_semantics = [#tpu.dimension_semantics<parallel>, #tpu.dimension_semantics<parallel>], iteration_bounds = array<i64: 2, 1>, scalar_prefetch = 0 : i64, scratch_operands = 7 : i64, tpu.core_type = #tpu.core_type<tc>, window_params = [{}, {transform_indices = @transform_1, window_bounds = array<i64: 3, 16, 128>}, {transform_indices = @transform_2, window_bounds = array<i64: 16, 128>}]} {
    %c16_i32 = arith.constant 16 : i32
    %0 = arith.muli %arg0, %c16_i32 : i32
    %1 = arith.sitofp %0 : i32 to f32
    %c128_i32 = arith.constant 128 : i32
    %2 = arith.muli %arg1, %c128_i32 : i32
    %3 = arith.sitofp %2 : i32 to f32
    %cst = arith.constant 1.500000e+01 : f32
    %4 = arith.addf %1, %cst : f32
    %cst_0 = arith.constant 1.270000e+02 : f32
    %5 = arith.addf %3, %cst_0 : f32
    %6 = tpu.iota {dimensions = array<i32: 0>} : vector<16x128xi32>
    %7 = arith.sitofp %6 : vector<16x128xi32> to vector<16x128xf32>
    %8 = vector.broadcast %1 : f32 to vector<16x128xf32>
    %9 = arith.addf %8, %7 : vector<16x128xf32>
    %10 = tpu.iota {dimensions = array<i32: 1>} : vector<16x128xi32>
    %11 = arith.sitofp %10 : vector<16x128xi32> to vector<16x128xf32>
    %12 = vector.broadcast %3 : f32 to vector<16x128xf32>
    %13 = arith.addf %12, %11 : vector<16x128xf32>
    %cst_1 = arith.constant 1.000000e+00 : f32
    %14 = vector.broadcast %cst_1 : f32 to vector<16x128xf32>
    %c0 = arith.constant 0 : index
    %c0_2 = arith.constant 0 : index
    %15 = vector.load %arg7[%c0, %c0_2] : memref<16x128xf32, #tpu.memory_space<vmem>>, vector<16x128xf32>
    tpu.vector_store %arg7[%c0, %c0_2], %14 {strides = array<i32>} : memref<16x128xf32, #tpu.memory_space<vmem>>, vector<16x128xf32>,
    %cst_3 = arith.constant 0.000000e+00 : f32
    %16 = vector.broadcast %cst_3 : f32 to vector<16x128xf32>
    %c0_4 = arith.constant 0 : index
    %c0_5 = arith.constant 0 : index
    %17 = vector.load %arg8[%c0_4, %c0_5] : memref<16x128xf32, #tpu.memory_space<vmem>>, vector<16x128xf32>
    tpu.vector_store %arg8[%c0_4, %c0_5], %16 {strides = array<i32>} : memref<16x128xf32, #tpu.memory_space<vmem>>, vector<16x128xf32>,
    %cst_6 = arith.constant 0.000000e+00 : f32
    %18 = vector.broadcast %cst_6 : f32 to vector<16x128xf32>
    %c0_7 = arith.constant 0 : index
    %c0_8 = arith.constant 0 : index
    %19 = vector.load %arg9[%c0_7, %c0_8] : memref<16x128xf32, #tpu.memory_space<vmem>>, vector<16x128xf32>
    tpu.vector_store %arg9[%c0_7, %c0_8], %18 {strides = array<i32>} : memref<16x128xf32, #tpu.memory_space<vmem>>, vector<16x128xf32>,
    %cst_9 = arith.constant 0.000000e+00 : f32
    %20 = vector.broadcast %cst_9 : f32 to vector<16x128xf32>
    %c0_10 = arith.constant 0 : index
    %c0_11 = arith.constant 0 : index
    %21 = vector.load %arg10[%c0_10, %c0_11] : memref<16x128xf32, #tpu.memory_space<vmem>>, vector<16x128xf32>
    tpu.vector_store %arg10[%c0_10, %c0_11], %20 {strides = array<i32>} : memref<16x128xf32, #tpu.memory_space<vmem>>, vector<16x128xf32>,
    %cst_12 = arith.constant 1.000000e+00 : f32
    %22 = vector.broadcast %cst_12 : f32 to vector<16x128xf32>
    %c0_13 = arith.constant 0 : index
    %c0_14 = arith.constant 0 : index
    %23 = vector.load %arg11[%c0_13, %c0_14] : memref<16x128xf32, #tpu.memory_space<vmem>>, vector<16x128xf32>
    tpu.vector_store %arg11[%c0_13, %c0_14], %22 {strides = array<i32>} : memref<16x128xf32, #tpu.memory_space<vmem>>, vector<16x128xf32>,
    %c0_i32 = arith.constant 0 : i32
    %c0_i32_15 = arith.constant 0 : i32
    %c0_i32_16 = arith.constant 0 : i32
    %c0_i32_17 = arith.constant 0 : i32
    %c0_i32_18 = arith.constant 0 : i32
    %24 = tpu.memref_slice %arg2[%c0_i32, %c0_i32_17, %c0_i32_18] : memref<1x16x256xf32, #tpu.memory_space<any>> -> memref<1x16x256xf32, #tpu.memory_space<any>>
    %25 = tpu.memref_squeeze %24 : memref<1x16x256xf32, #tpu.memory_space<any>> -> memref<16x256xf32, #tpu.memory_space<any>>
    %c0_i32_19 = arith.constant 0 : i32
    %c0_i32_20 = arith.constant 0 : i32
    %26 = tpu.memref_slice %arg5[%c0_i32_15, %c0_i32_19, %c0_i32_20] : memref<2x16x256xf32, #tpu.memory_space<smem>> -> memref<1x16x256xf32, #tpu.memory_space<smem>>
    %27 = tpu.memref_squeeze %26 : memref<1x16x256xf32, #tpu.memory_space<smem>> -> memref<16x256xf32, #tpu.memory_space<smem>>
    %28 = tpu.memref_slice %arg6[%c0_i32_16] : memref<2x!tpu.dma_semaphore, #tpu.memory_space<semaphore_mem>> -> memref<1x!tpu.dma_semaphore, #tpu.memory_space<semaphore_mem>>
    %29 = tpu.memref_squeeze %28 : memref<1x!tpu.dma_semaphore, #tpu.memory_space<semaphore_mem>> -> memref<!tpu.dma_semaphore, #tpu.memory_space<semaphore_mem>>
    tpu.enqueue_dma source(%25 : memref<16x256xf32, #tpu.memory_space<any>>) target(%27 : memref<16x256xf32, #tpu.memory_space<smem>>) target_semaphore(%29 : memref<!tpu.dma_semaphore, #tpu.memory_space<semaphore_mem>>)
    %c0_i32_21 = arith.constant 0 : i32
    %c1_i32 = arith.constant 1 : i32
    %30 = arith.andi %c0_i32_21, %c1_i32 : i32
    %c0_i32_22 = arith.constant 0 : i32
    %c0_i32_23 = arith.constant 0 : i32
    %c0_i32_24 = arith.constant 0 : i32
    %31 = tpu.memref_slice %arg2[%c0_i32_22, %c0_i32_23, %c0_i32_24] : memref<1x16x256xf32, #tpu.memory_space<any>> -> memref<1x16x256xf32, #tpu.memory_space<any>>
    %32 = tpu.memref_squeeze %31 : memref<1x16x256xf32, #tpu.memory_space<any>> -> memref<16x256xf32, #tpu.memory_space<any>>
    %c0_i32_25 = arith.constant 0 : i32
    %c0_i32_26 = arith.constant 0 : i32
    %33 = tpu.memref_slice %arg5[%30, %c0_i32_25, %c0_i32_26] : memref<2x16x256xf32, #tpu.memory_space<smem>> -> memref<1x16x256xf32, #tpu.memory_space<smem>>
    %34 = tpu.memref_squeeze %33 : memref<1x16x256xf32, #tpu.memory_space<smem>> -> memref<16x256xf32, #tpu.memory_space<smem>>
    %35 = tpu.memref_slice %arg6[%30] : memref<2x!tpu.dma_semaphore, #tpu.memory_space<semaphore_mem>> -> memref<1x!tpu.dma_semaphore, #tpu.memory_space<semaphore_mem>>
    %36 = tpu.memref_squeeze %35 : memref<1x!tpu.dma_semaphore, #tpu.memory_space<semaphore_mem>> -> memref<!tpu.dma_semaphore, #tpu.memory_space<semaphore_mem>>
    tpu.wait_dma2 semaphore(%36 : memref<!tpu.dma_semaphore, #tpu.memory_space<semaphore_mem>>) src(%32 : memref<16x256xf32, #tpu.memory_space<any>>) dst(%34 : memref<16x256xf32, #tpu.memory_space<smem>>)
    %c1_i32_27 = arith.constant 1 : i32
    %37 = arith.addi %c0_i32_21, %c1_i32_27 : i32
    %c1_i32_28 = arith.constant 1 : i32
    %38 = arith.cmpi slt, %37, %c1_i32_28 : i32
    %39 = arith.extui %38 : i1 to i32
    %c0_i32_29 = arith.constant 0 : i32
    %40 = arith.cmpi ne, %39, %c0_i32_29 : i32
    scf.if %40 {
      %c1_i32_51 = arith.constant 1 : i32
      %56 = arith.addi %c0_i32_21, %c1_i32_51 : i32
      %c1_i32_52 = arith.constant 1 : i32
      %57 = arith.subi %c1_i32_52, %30 : i32
      %c0_i32_53 = arith.constant 0 : i32
      %c0_i32_54 = arith.constant 0 : i32
      %58 = tpu.memref_slice %arg2[%56, %c0_i32_53, %c0_i32_54] : memref<1x16x256xf32, #tpu.memory_space<any>> -> memref<1x16x256xf32, #tpu.memory_space<any>>
      %59 = tpu.memref_squeeze %58 : memref<1x16x256xf32, #tpu.memory_space<any>> -> memref<16x256xf32, #tpu.memory_space<any>>
      %c0_i32_55 = arith.constant 0 : i32
      %c0_i32_56 = arith.constant 0 : i32
      %60 = tpu.memref_slice %arg5[%57, %c0_i32_55, %c0_i32_56] : memref<2x16x256xf32, #tpu.memory_space<smem>> -> memref<1x16x256xf32, #tpu.memory_space<smem>>
      %61 = tpu.memref_squeeze %60 : memref<1x16x256xf32, #tpu.memory_space<smem>> -> memref<16x256xf32, #tpu.memory_space<smem>>
      %62 = tpu.memref_slice %arg6[%57] : memref<2x!tpu.dma_semaphore, #tpu.memory_space<semaphore_mem>> -> memref<1x!tpu.dma_semaphore, #tpu.memory_space<semaphore_mem>>
      %63 = tpu.memref_squeeze %62 : memref<1x!tpu.dma_semaphore, #tpu.memory_space<semaphore_mem>> -> memref<!tpu.dma_semaphore, #tpu.memory_space<semaphore_mem>>
      tpu.enqueue_dma source(%59 : memref<16x256xf32, #tpu.memory_space<any>>) target(%61 : memref<16x256xf32, #tpu.memory_space<smem>>) target_semaphore(%63 : memref<!tpu.dma_semaphore, #tpu.memory_space<semaphore_mem>>)
    } else {
    }
    %c0_i32_30 = arith.constant 0 : i32
    %c64_i32 = arith.constant 64 : i32
    %41 = arith.addi %c0_i32_30, %c64_i32 : i32
    %c1_i32_31 = arith.constant 1 : i32
    scf.for %arg12 = %c0_i32_30 to %41 step %c1_i32_31  : i32 {
      %c4_i32 = arith.constant 4 : i32
      %56 = arith.muli %arg12, %c4_i32 : i32
      %c0_i32_51 = arith.constant 0 : i32
      %57 = arith.addi %56, %c0_i32_51 : i32
      %58 = arith.index_cast %30 : i32 to index
      %c9 = arith.constant 9 : index
      %59 = arith.index_cast %57 : i32 to index
      %60 = memref.load %arg5[%58, %c9, %59] : memref<2x16x256xf32, #tpu.memory_space<smem>>
      %61 = arith.index_cast %30 : i32 to index
      %c10 = arith.constant 10 : index
      %62 = arith.index_cast %57 : i32 to index
      %63 = memref.load %arg5[%61, %c10, %62] : memref<2x16x256xf32, #tpu.memory_space<smem>>
      %64 = arith.index_cast %30 : i32 to index
      %c11 = arith.constant 11 : index
      %65 = arith.index_cast %57 : i32 to index
      %66 = memref.load %arg5[%64, %c11, %65] : memref<2x16x256xf32, #tpu.memory_space<smem>>
      %67 = arith.index_cast %30 : i32 to index
      %c12 = arith.constant 12 : index
      %68 = arith.index_cast %57 : i32 to index
      %69 = memref.load %arg5[%67, %c12, %68] : memref<2x16x256xf32, #tpu.memory_space<smem>>
      %70 = arith.cmpf oge, %63, %3 : f32
      %71 = arith.cmpf ole, %60, %5 : f32
      %72 = arith.andi %70, %71 : i1
      %73 = arith.cmpf oge, %69, %1 : f32
      %74 = arith.andi %72, %73 : i1
      %75 = arith.cmpf ole, %66, %4 : f32
      %76 = arith.andi %74, %75 : i1
      %77 = arith.extui %76 : i1 to i32
      %c0_i32_52 = arith.constant 0 : i32
      %78 = arith.cmpi ne, %77, %c0_i32_52 : i32
      scf.if %78 {
        %148 = arith.index_cast %30 : i32 to index
        %c0_72 = arith.constant 0 : index
        %149 = arith.index_cast %57 : i32 to index
        %150 = memref.load %arg5[%148, %c0_72, %149] : memref<2x16x256xf32, #tpu.memory_space<smem>>
        %151 = arith.index_cast %30 : i32 to index
        %c1_73 = arith.constant 1 : index
        %152 = arith.index_cast %57 : i32 to index
        %153 = memref.load %arg5[%151, %c1_73, %152] : memref<2x16x256xf32, #tpu.memory_space<smem>>
        %154 = arith.index_cast %30 : i32 to index
        %c2_74 = arith.constant 2 : index
        %155 = arith.index_cast %57 : i32 to index
        %156 = memref.load %arg5[%154, %c2_74, %155] : memref<2x16x256xf32, #tpu.memory_space<smem>>
        %157 = arith.index_cast %30 : i32 to index
        %c3 = arith.constant 3 : index
        %158 = arith.index_cast %57 : i32 to index
        %159 = memref.load %arg5[%157, %c3, %158] : memref<2x16x256xf32, #tpu.memory_space<smem>>
        %160 = arith.index_cast %30 : i32 to index
        %c4 = arith.constant 4 : index
        %161 = arith.index_cast %57 : i32 to index
        %162 = memref.load %arg5[%160, %c4, %161] : memref<2x16x256xf32, #tpu.memory_space<smem>>
        %163 = arith.index_cast %30 : i32 to index
        %c5 = arith.constant 5 : index
        %164 = arith.index_cast %57 : i32 to index
        %165 = memref.load %arg5[%163, %c5, %164] : memref<2x16x256xf32, #tpu.memory_space<smem>>
        %166 = arith.index_cast %30 : i32 to index
        %c6 = arith.constant 6 : index
        %167 = arith.index_cast %57 : i32 to index
        %168 = memref.load %arg5[%166, %c6, %167] : memref<2x16x256xf32, #tpu.memory_space<smem>>
        %169 = arith.index_cast %30 : i32 to index
        %c7 = arith.constant 7 : index
        %170 = arith.index_cast %57 : i32 to index
        %171 = memref.load %arg5[%169, %c7, %170] : memref<2x16x256xf32, #tpu.memory_space<smem>>
        %172 = arith.index_cast %30 : i32 to index
        %c8 = arith.constant 8 : index
        %173 = arith.index_cast %57 : i32 to index
        %174 = memref.load %arg5[%172, %c8, %173] : memref<2x16x256xf32, #tpu.memory_space<smem>>
        %175 = vector.broadcast %150 : f32 to vector<16x128xf32>
        %176 = arith.subf %13, %175 : vector<16x128xf32>
        %177 = vector.broadcast %153 : f32 to vector<16x128xf32>
        %178 = arith.subf %9, %177 : vector<16x128xf32>
        %179 = vector.broadcast %156 : f32 to vector<16x128xf32>
        %180 = arith.mulf %179, %176 : vector<16x128xf32>
        %181 = arith.mulf %180, %176 : vector<16x128xf32>
        %182 = vector.broadcast %162 : f32 to vector<16x128xf32>
        %183 = arith.mulf %182, %178 : vector<16x128xf32>
        %184 = arith.mulf %183, %178 : vector<16x128xf32>
        %185 = arith.addf %181, %184 : vector<16x128xf32>
        %cst_75 = arith.constant -5.000000e-01 : f32
        %186 = vector.broadcast %cst_75 : f32 to vector<16x128xf32>
        %187 = arith.mulf %186, %185 : vector<16x128xf32>
        %188 = vector.broadcast %159 : f32 to vector<16x128xf32>
        %189 = arith.mulf %188, %176 : vector<16x128xf32>
        %190 = arith.mulf %189, %178 : vector<16x128xf32>
        %191 = arith.subf %187, %190 : vector<16x128xf32>
        %192 = math.exp %191 : vector<16x128xf32>
        %193 = vector.broadcast %165 : f32 to vector<16x128xf32>
        %194 = arith.mulf %193, %192 : vector<16x128xf32>
        %cst_76 = arith.constant 9.900000e-01 : f32
        %195 = vector.broadcast %cst_76 : f32 to vector<16x128xf32>
        %196 = arith.minimumf %195, %194 : vector<16x128xf32>
        %cst_77 = arith.constant 0.000000e+00 : f32
        %197 = vector.broadcast %cst_77 : f32 to vector<16x128xf32>
        %198 = arith.cmpf ole, %191, %197 : vector<16x128xf32>
        %cst_78 = arith.constant 0.00392156886 : f32
        %199 = vector.broadcast %cst_78 : f32 to vector<16x128xf32>
        %200 = arith.cmpf oge, %196, %199 : vector<16x128xf32>
        %201 = arith.andi %198, %200 : vector<16x128xi1>
        %c0_79 = arith.constant 0 : index
        %c0_80 = arith.constant 0 : index
        %202 = vector.load %arg7[%c0_79, %c0_80] : memref<16x128xf32, #tpu.memory_space<vmem>>, vector<16x128xf32>
        %c0_81 = arith.constant 0 : index
        %c0_82 = arith.constant 0 : index
        %203 = vector.load %arg11[%c0_81, %c0_82] : memref<16x128xf32, #tpu.memory_space<vmem>>, vector<16x128xf32>
        %cst_83 = arith.constant 1.000000e+00 : f32
        %204 = vector.broadcast %cst_83 : f32 to vector<16x128xf32>
        %205 = arith.subf %204, %196 : vector<16x128xf32>
        %206 = arith.mulf %202, %205 : vector<16x128xf32>
        %cst_84 = arith.constant 9.99999974E-5 : f32
        %207 = vector.broadcast %cst_84 : f32 to vector<16x128xf32>
        %208 = arith.cmpf oge, %206, %207 : vector<16x128xf32>
        %209 = arith.andi %201, %208 : vector<16x128xi1>
        %cst_85 = arith.constant 0.000000e+00 : f32
        %210 = vector.broadcast %cst_85 : f32 to vector<16x128xf32>
        %211 = arith.cmpf ogt, %203, %210 : vector<16x128xf32>
        %212 = arith.andi %209, %211 : vector<16x128xi1>
        %213 = arith.mulf %196, %202 : vector<16x128xf32>
        %cst_86 = arith.constant 0.000000e+00 : f32
        %214 = vector.broadcast %cst_86 : f32 to vector<16x128xf32>
        %215 = arith.select %212, %213, %214 : vector<16x128xi1>, vector<16x128xf32>
        %c0_87 = arith.constant 0 : index
        %c0_88 = arith.constant 0 : index
        %216 = vector.load %arg8[%c0_87, %c0_88] : memref<16x128xf32, #tpu.memory_space<vmem>>, vector<16x128xf32>
        %217 = vector.broadcast %168 : f32 to vector<16x128xf32>
        %218 = arith.mulf %217, %215 : vector<16x128xf32>
        %219 = arith.addf %216, %218 : vector<16x128xf32>
        %c0_89 = arith.constant 0 : index
        %c0_90 = arith.constant 0 : index
        %220 = vector.load %arg8[%c0_89, %c0_90] : memref<16x128xf32, #tpu.memory_space<vmem>>, vector<16x128xf32>
        tpu.vector_store %arg8[%c0_89, %c0_90], %219 {strides = array<i32>} : memref<16x128xf32, #tpu.memory_space<vmem>>, vector<16x128xf32>,
        %c0_91 = arith.constant 0 : index
        %c0_92 = arith.constant 0 : index
        %221 = vector.load %arg9[%c0_91, %c0_92] : memref<16x128xf32, #tpu.memory_space<vmem>>, vector<16x128xf32>
        %222 = vector.broadcast %171 : f32 to vector<16x128xf32>
        %223 = arith.mulf %222, %215 : vector<16x128xf32>
        %224 = arith.addf %221, %223 : vector<16x128xf32>
        %c0_93 = arith.constant 0 : index
        %c0_94 = arith.constant 0 : index
        %225 = vector.load %arg9[%c0_93, %c0_94] : memref<16x128xf32, #tpu.memory_space<vmem>>, vector<16x128xf32>
        tpu.vector_store %arg9[%c0_93, %c0_94], %224 {strides = array<i32>} : memref<16x128xf32, #tpu.memory_space<vmem>>, vector<16x128xf32>,
        %c0_95 = arith.constant 0 : index
        %c0_96 = arith.constant 0 : index
        %226 = vector.load %arg10[%c0_95, %c0_96] : memref<16x128xf32, #tpu.memory_space<vmem>>, vector<16x128xf32>
        %227 = vector.broadcast %174 : f32 to vector<16x128xf32>
        %228 = arith.mulf %227, %215 : vector<16x128xf32>
        %229 = arith.addf %226, %228 : vector<16x128xf32>
        %c0_97 = arith.constant 0 : index
        %c0_98 = arith.constant 0 : index
        %230 = vector.load %arg10[%c0_97, %c0_98] : memref<16x128xf32, #tpu.memory_space<vmem>>, vector<16x128xf32>
        tpu.vector_store %arg10[%c0_97, %c0_98], %229 {strides = array<i32>} : memref<16x128xf32, #tpu.memory_space<vmem>>, vector<16x128xf32>,
        %231 = arith.select %212, %206, %202 : vector<16x128xi1>, vector<16x128xf32>
        %c0_99 = arith.constant 0 : index
        %c0_100 = arith.constant 0 : index
        %232 = vector.load %arg7[%c0_99, %c0_100] : memref<16x128xf32, #tpu.memory_space<vmem>>, vector<16x128xf32>
        tpu.vector_store %arg7[%c0_99, %c0_100], %231 {strides = array<i32>} : memref<16x128xf32, #tpu.memory_space<vmem>>, vector<16x128xf32>,
        %cst_101 = arith.constant dense<true> : vector<16x128xi1>
        %233 = arith.xori %208, %cst_101 : vector<16x128xi1>
        %234 = arith.andi %201, %233 : vector<16x128xi1>
        %cst_102 = arith.constant 0.000000e+00 : f32
        %235 = vector.broadcast %cst_102 : f32 to vector<16x128xf32>
        %236 = arith.select %234, %235, %203 : vector<16x128xi1>, vector<16x128xf32>
        %c0_103 = arith.constant 0 : index
        %c0_104 = arith.constant 0 : index
        %237 = vector.load %arg11[%c0_103, %c0_104] : memref<16x128xf32, #tpu.memory_space<vmem>>, vector<16x128xf32>
        tpu.vector_store %arg11[%c0_103, %c0_104], %236 {strides = array<i32>} : memref<16x128xf32, #tpu.memory_space<vmem>>, vector<16x128xf32>,
      } else {
      }
      %c4_i32_53 = arith.constant 4 : i32
      %79 = arith.muli %arg12, %c4_i32_53 : i32
      %c1_i32_54 = arith.constant 1 : i32
      %80 = arith.addi %79, %c1_i32_54 : i32
      %81 = arith.index_cast %30 : i32 to index
      %c9_55 = arith.constant 9 : index
      %82 = arith.index_cast %80 : i32 to index
      %83 = memref.load %arg5[%81, %c9_55, %82] : memref<2x16x256xf32, #tpu.memory_space<smem>>
      %84 = arith.index_cast %30 : i32 to index
      %c10_56 = arith.constant 10 : index
      %85 = arith.index_cast %80 : i32 to index
      %86 = memref.load %arg5[%84, %c10_56, %85] : memref<2x16x256xf32, #tpu.memory_space<smem>>
      %87 = arith.index_cast %30 : i32 to index
      %c11_57 = arith.constant 11 : index
      %88 = arith.index_cast %80 : i32 to index
      %89 = memref.load %arg5[%87, %c11_57, %88] : memref<2x16x256xf32, #tpu.memory_space<smem>>
      %90 = arith.index_cast %30 : i32 to index
      %c12_58 = arith.constant 12 : index
      %91 = arith.index_cast %80 : i32 to index
      %92 = memref.load %arg5[%90, %c12_58, %91] : memref<2x16x256xf32, #tpu.memory_space<smem>>
      %93 = arith.cmpf oge, %86, %3 : f32
      %94 = arith.cmpf ole, %83, %5 : f32
      %95 = arith.andi %93, %94 : i1
      %96 = arith.cmpf oge, %92, %1 : f32
      %97 = arith.andi %95, %96 : i1
      %98 = arith.cmpf ole, %89, %4 : f32
      %99 = arith.andi %97, %98 : i1
      %100 = arith.extui %99 : i1 to i32
      %c0_i32_59 = arith.constant 0 : i32
      %101 = arith.cmpi ne, %100, %c0_i32_59 : i32
      scf.if %101 {
        %148 = arith.index_cast %30 : i32 to index
        %c0_72 = arith.constant 0 : index
        %149 = arith.index_cast %80 : i32 to index
        %150 = memref.load %arg5[%148, %c0_72, %149] : memref<2x16x256xf32, #tpu.memory_space<smem>>
        %151 = arith.index_cast %30 : i32 to index
        %c1_73 = arith.constant 1 : index
        %152 = arith.index_cast %80 : i32 to index
        %153 = memref.load %arg5[%151, %c1_73, %152] : memref<2x16x256xf32, #tpu.memory_space<smem>>
        %154 = arith.index_cast %30 : i32 to index
        %c2_74 = arith.constant 2 : index
        %155 = arith.index_cast %80 : i32 to index
        %156 = memref.load %arg5[%154, %c2_74, %155] : memref<2x16x256xf32, #tpu.memory_space<smem>>
        %157 = arith.index_cast %30 : i32 to index
        %c3 = arith.constant 3 : index
        %158 = arith.index_cast %80 : i32 to index
        %159 = memref.load %arg5[%157, %c3, %158] : memref<2x16x256xf32, #tpu.memory_space<smem>>
        %160 = arith.index_cast %30 : i32 to index
        %c4 = arith.constant 4 : index
        %161 = arith.index_cast %80 : i32 to index
        %162 = memref.load %arg5[%160, %c4, %161] : memref<2x16x256xf32, #tpu.memory_space<smem>>
        %163 = arith.index_cast %30 : i32 to index
        %c5 = arith.constant 5 : index
        %164 = arith.index_cast %80 : i32 to index
        %165 = memref.load %arg5[%163, %c5, %164] : memref<2x16x256xf32, #tpu.memory_space<smem>>
        %166 = arith.index_cast %30 : i32 to index
        %c6 = arith.constant 6 : index
        %167 = arith.index_cast %80 : i32 to index
        %168 = memref.load %arg5[%166, %c6, %167] : memref<2x16x256xf32, #tpu.memory_space<smem>>
        %169 = arith.index_cast %30 : i32 to index
        %c7 = arith.constant 7 : index
        %170 = arith.index_cast %80 : i32 to index
        %171 = memref.load %arg5[%169, %c7, %170] : memref<2x16x256xf32, #tpu.memory_space<smem>>
        %172 = arith.index_cast %30 : i32 to index
        %c8 = arith.constant 8 : index
        %173 = arith.index_cast %80 : i32 to index
        %174 = memref.load %arg5[%172, %c8, %173] : memref<2x16x256xf32, #tpu.memory_space<smem>>
        %175 = vector.broadcast %150 : f32 to vector<16x128xf32>
        %176 = arith.subf %13, %175 : vector<16x128xf32>
        %177 = vector.broadcast %153 : f32 to vector<16x128xf32>
        %178 = arith.subf %9, %177 : vector<16x128xf32>
        %179 = vector.broadcast %156 : f32 to vector<16x128xf32>
        %180 = arith.mulf %179, %176 : vector<16x128xf32>
        %181 = arith.mulf %180, %176 : vector<16x128xf32>
        %182 = vector.broadcast %162 : f32 to vector<16x128xf32>
        %183 = arith.mulf %182, %178 : vector<16x128xf32>
        %184 = arith.mulf %183, %178 : vector<16x128xf32>
        %185 = arith.addf %181, %184 : vector<16x128xf32>
        %cst_75 = arith.constant -5.000000e-01 : f32
        %186 = vector.broadcast %cst_75 : f32 to vector<16x128xf32>
        %187 = arith.mulf %186, %185 : vector<16x128xf32>
        %188 = vector.broadcast %159 : f32 to vector<16x128xf32>
        %189 = arith.mulf %188, %176 : vector<16x128xf32>
        %190 = arith.mulf %189, %178 : vector<16x128xf32>
        %191 = arith.subf %187, %190 : vector<16x128xf32>
        %192 = math.exp %191 : vector<16x128xf32>
        %193 = vector.broadcast %165 : f32 to vector<16x128xf32>
        %194 = arith.mulf %193, %192 : vector<16x128xf32>
        %cst_76 = arith.constant 9.900000e-01 : f32
        %195 = vector.broadcast %cst_76 : f32 to vector<16x128xf32>
        %196 = arith.minimumf %195, %194 : vector<16x128xf32>
        %cst_77 = arith.constant 0.000000e+00 : f32
        %197 = vector.broadcast %cst_77 : f32 to vector<16x128xf32>
        %198 = arith.cmpf ole, %191, %197 : vector<16x128xf32>
        %cst_78 = arith.constant 0.00392156886 : f32
        %199 = vector.broadcast %cst_78 : f32 to vector<16x128xf32>
        %200 = arith.cmpf oge, %196, %199 : vector<16x128xf32>
        %201 = arith.andi %198, %200 : vector<16x128xi1>
        %c0_79 = arith.constant 0 : index
        %c0_80 = arith.constant 0 : index
        %202 = vector.load %arg7[%c0_79, %c0_80] : memref<16x128xf32, #tpu.memory_space<vmem>>, vector<16x128xf32>
        %c0_81 = arith.constant 0 : index
        %c0_82 = arith.constant 0 : index
        %203 = vector.load %arg11[%c0_81, %c0_82] : memref<16x128xf32, #tpu.memory_space<vmem>>, vector<16x128xf32>
        %cst_83 = arith.constant 1.000000e+00 : f32
        %204 = vector.broadcast %cst_83 : f32 to vector<16x128xf32>
        %205 = arith.subf %204, %196 : vector<16x128xf32>
        %206 = arith.mulf %202, %205 : vector<16x128xf32>
        %cst_84 = arith.constant 9.99999974E-5 : f32
        %207 = vector.broadcast %cst_84 : f32 to vector<16x128xf32>
        %208 = arith.cmpf oge, %206, %207 : vector<16x128xf32>
        %209 = arith.andi %201, %208 : vector<16x128xi1>
        %cst_85 = arith.constant 0.000000e+00 : f32
        %210 = vector.broadcast %cst_85 : f32 to vector<16x128xf32>
        %211 = arith.cmpf ogt, %203, %210 : vector<16x128xf32>
        %212 = arith.andi %209, %211 : vector<16x128xi1>
        %213 = arith.mulf %196, %202 : vector<16x128xf32>
        %cst_86 = arith.constant 0.000000e+00 : f32
        %214 = vector.broadcast %cst_86 : f32 to vector<16x128xf32>
        %215 = arith.select %212, %213, %214 : vector<16x128xi1>, vector<16x128xf32>
        %c0_87 = arith.constant 0 : index
        %c0_88 = arith.constant 0 : index
        %216 = vector.load %arg8[%c0_87, %c0_88] : memref<16x128xf32, #tpu.memory_space<vmem>>, vector<16x128xf32>
        %217 = vector.broadcast %168 : f32 to vector<16x128xf32>
        %218 = arith.mulf %217, %215 : vector<16x128xf32>
        %219 = arith.addf %216, %218 : vector<16x128xf32>
        %c0_89 = arith.constant 0 : index
        %c0_90 = arith.constant 0 : index
        %220 = vector.load %arg8[%c0_89, %c0_90] : memref<16x128xf32, #tpu.memory_space<vmem>>, vector<16x128xf32>
        tpu.vector_store %arg8[%c0_89, %c0_90], %219 {strides = array<i32>} : memref<16x128xf32, #tpu.memory_space<vmem>>, vector<16x128xf32>,
        %c0_91 = arith.constant 0 : index
        %c0_92 = arith.constant 0 : index
        %221 = vector.load %arg9[%c0_91, %c0_92] : memref<16x128xf32, #tpu.memory_space<vmem>>, vector<16x128xf32>
        %222 = vector.broadcast %171 : f32 to vector<16x128xf32>
        %223 = arith.mulf %222, %215 : vector<16x128xf32>
        %224 = arith.addf %221, %223 : vector<16x128xf32>
        %c0_93 = arith.constant 0 : index
        %c0_94 = arith.constant 0 : index
        %225 = vector.load %arg9[%c0_93, %c0_94] : memref<16x128xf32, #tpu.memory_space<vmem>>, vector<16x128xf32>
        tpu.vector_store %arg9[%c0_93, %c0_94], %224 {strides = array<i32>} : memref<16x128xf32, #tpu.memory_space<vmem>>, vector<16x128xf32>,
        %c0_95 = arith.constant 0 : index
        %c0_96 = arith.constant 0 : index
        %226 = vector.load %arg10[%c0_95, %c0_96] : memref<16x128xf32, #tpu.memory_space<vmem>>, vector<16x128xf32>
        %227 = vector.broadcast %174 : f32 to vector<16x128xf32>
        %228 = arith.mulf %227, %215 : vector<16x128xf32>
        %229 = arith.addf %226, %228 : vector<16x128xf32>
        %c0_97 = arith.constant 0 : index
        %c0_98 = arith.constant 0 : index
        %230 = vector.load %arg10[%c0_97, %c0_98] : memref<16x128xf32, #tpu.memory_space<vmem>>, vector<16x128xf32>
        tpu.vector_store %arg10[%c0_97, %c0_98], %229 {strides = array<i32>} : memref<16x128xf32, #tpu.memory_space<vmem>>, vector<16x128xf32>,
        %231 = arith.select %212, %206, %202 : vector<16x128xi1>, vector<16x128xf32>
        %c0_99 = arith.constant 0 : index
        %c0_100 = arith.constant 0 : index
        %232 = vector.load %arg7[%c0_99, %c0_100] : memref<16x128xf32, #tpu.memory_space<vmem>>, vector<16x128xf32>
        tpu.vector_store %arg7[%c0_99, %c0_100], %231 {strides = array<i32>} : memref<16x128xf32, #tpu.memory_space<vmem>>, vector<16x128xf32>,
        %cst_101 = arith.constant dense<true> : vector<16x128xi1>
        %233 = arith.xori %208, %cst_101 : vector<16x128xi1>
        %234 = arith.andi %201, %233 : vector<16x128xi1>
        %cst_102 = arith.constant 0.000000e+00 : f32
        %235 = vector.broadcast %cst_102 : f32 to vector<16x128xf32>
        %236 = arith.select %234, %235, %203 : vector<16x128xi1>, vector<16x128xf32>
        %c0_103 = arith.constant 0 : index
        %c0_104 = arith.constant 0 : index
        %237 = vector.load %arg11[%c0_103, %c0_104] : memref<16x128xf32, #tpu.memory_space<vmem>>, vector<16x128xf32>
        tpu.vector_store %arg11[%c0_103, %c0_104], %236 {strides = array<i32>} : memref<16x128xf32, #tpu.memory_space<vmem>>, vector<16x128xf32>,
      } else {
      }
      %c4_i32_60 = arith.constant 4 : i32
      %102 = arith.muli %arg12, %c4_i32_60 : i32
      %c2_i32 = arith.constant 2 : i32
      %103 = arith.addi %102, %c2_i32 : i32
      %104 = arith.index_cast %30 : i32 to index
      %c9_61 = arith.constant 9 : index
      %105 = arith.index_cast %103 : i32 to index
      %106 = memref.load %arg5[%104, %c9_61, %105] : memref<2x16x256xf32, #tpu.memory_space<smem>>
      %107 = arith.index_cast %30 : i32 to index
      %c10_62 = arith.constant 10 : index
      %108 = arith.index_cast %103 : i32 to index
      %109 = memref.load %arg5[%107, %c10_62, %108] : memref<2x16x256xf32, #tpu.memory_space<smem>>
      %110 = arith.index_cast %30 : i32 to index
      %c11_63 = arith.constant 11 : index
      %111 = arith.index_cast %103 : i32 to index
      %112 = memref.load %arg5[%110, %c11_63, %111] : memref<2x16x256xf32, #tpu.memory_space<smem>>
      %113 = arith.index_cast %30 : i32 to index
      %c12_64 = arith.constant 12 : index
      %114 = arith.index_cast %103 : i32 to index
      %115 = memref.load %arg5[%113, %c12_64, %114] : memref<2x16x256xf32, #tpu.memory_space<smem>>
      %116 = arith.cmpf oge, %109, %3 : f32
      %117 = arith.cmpf ole, %106, %5 : f32
      %118 = arith.andi %116, %117 : i1
      %119 = arith.cmpf oge, %115, %1 : f32
      %120 = arith.andi %118, %119 : i1
      %121 = arith.cmpf ole, %112, %4 : f32
      %122 = arith.andi %120, %121 : i1
      %123 = arith.extui %122 : i1 to i32
      %c0_i32_65 = arith.constant 0 : i32
      %124 = arith.cmpi ne, %123, %c0_i32_65 : i32
      scf.if %124 {
        %148 = arith.index_cast %30 : i32 to index
        %c0_72 = arith.constant 0 : index
        %149 = arith.index_cast %103 : i32 to index
        %150 = memref.load %arg5[%148, %c0_72, %149] : memref<2x16x256xf32, #tpu.memory_space<smem>>
        %151 = arith.index_cast %30 : i32 to index
        %c1_73 = arith.constant 1 : index
        %152 = arith.index_cast %103 : i32 to index
        %153 = memref.load %arg5[%151, %c1_73, %152] : memref<2x16x256xf32, #tpu.memory_space<smem>>
        %154 = arith.index_cast %30 : i32 to index
        %c2_74 = arith.constant 2 : index
        %155 = arith.index_cast %103 : i32 to index
        %156 = memref.load %arg5[%154, %c2_74, %155] : memref<2x16x256xf32, #tpu.memory_space<smem>>
        %157 = arith.index_cast %30 : i32 to index
        %c3 = arith.constant 3 : index
        %158 = arith.index_cast %103 : i32 to index
        %159 = memref.load %arg5[%157, %c3, %158] : memref<2x16x256xf32, #tpu.memory_space<smem>>
        %160 = arith.index_cast %30 : i32 to index
        %c4 = arith.constant 4 : index
        %161 = arith.index_cast %103 : i32 to index
        %162 = memref.load %arg5[%160, %c4, %161] : memref<2x16x256xf32, #tpu.memory_space<smem>>
        %163 = arith.index_cast %30 : i32 to index
        %c5 = arith.constant 5 : index
        %164 = arith.index_cast %103 : i32 to index
        %165 = memref.load %arg5[%163, %c5, %164] : memref<2x16x256xf32, #tpu.memory_space<smem>>
        %166 = arith.index_cast %30 : i32 to index
        %c6 = arith.constant 6 : index
        %167 = arith.index_cast %103 : i32 to index
        %168 = memref.load %arg5[%166, %c6, %167] : memref<2x16x256xf32, #tpu.memory_space<smem>>
        %169 = arith.index_cast %30 : i32 to index
        %c7 = arith.constant 7 : index
        %170 = arith.index_cast %103 : i32 to index
        %171 = memref.load %arg5[%169, %c7, %170] : memref<2x16x256xf32, #tpu.memory_space<smem>>
        %172 = arith.index_cast %30 : i32 to index
        %c8 = arith.constant 8 : index
        %173 = arith.index_cast %103 : i32 to index
        %174 = memref.load %arg5[%172, %c8, %173] : memref<2x16x256xf32, #tpu.memory_space<smem>>
        %175 = vector.broadcast %150 : f32 to vector<16x128xf32>
        %176 = arith.subf %13, %175 : vector<16x128xf32>
        %177 = vector.broadcast %153 : f32 to vector<16x128xf32>
        %178 = arith.subf %9, %177 : vector<16x128xf32>
        %179 = vector.broadcast %156 : f32 to vector<16x128xf32>
        %180 = arith.mulf %179, %176 : vector<16x128xf32>
        %181 = arith.mulf %180, %176 : vector<16x128xf32>
        %182 = vector.broadcast %162 : f32 to vector<16x128xf32>
        %183 = arith.mulf %182, %178 : vector<16x128xf32>
        %184 = arith.mulf %183, %178 : vector<16x128xf32>
        %185 = arith.addf %181, %184 : vector<16x128xf32>
        %cst_75 = arith.constant -5.000000e-01 : f32
        %186 = vector.broadcast %cst_75 : f32 to vector<16x128xf32>
        %187 = arith.mulf %186, %185 : vector<16x128xf32>
        %188 = vector.broadcast %159 : f32 to vector<16x128xf32>
        %189 = arith.mulf %188, %176 : vector<16x128xf32>
        %190 = arith.mulf %189, %178 : vector<16x128xf32>
        %191 = arith.subf %187, %190 : vector<16x128xf32>
        %192 = math.exp %191 : vector<16x128xf32>
        %193 = vector.broadcast %165 : f32 to vector<16x128xf32>
        %194 = arith.mulf %193, %192 : vector<16x128xf32>
        %cst_76 = arith.constant 9.900000e-01 : f32
        %195 = vector.broadcast %cst_76 : f32 to vector<16x128xf32>
        %196 = arith.minimumf %195, %194 : vector<16x128xf32>
        %cst_77 = arith.constant 0.000000e+00 : f32
        %197 = vector.broadcast %cst_77 : f32 to vector<16x128xf32>
        %198 = arith.cmpf ole, %191, %197 : vector<16x128xf32>
        %cst_78 = arith.constant 0.00392156886 : f32
        %199 = vector.broadcast %cst_78 : f32 to vector<16x128xf32>
        %200 = arith.cmpf oge, %196, %199 : vector<16x128xf32>
        %201 = arith.andi %198, %200 : vector<16x128xi1>
        %c0_79 = arith.constant 0 : index
        %c0_80 = arith.constant 0 : index
        %202 = vector.load %arg7[%c0_79, %c0_80] : memref<16x128xf32, #tpu.memory_space<vmem>>, vector<16x128xf32>
        %c0_81 = arith.constant 0 : index
        %c0_82 = arith.constant 0 : index
        %203 = vector.load %arg11[%c0_81, %c0_82] : memref<16x128xf32, #tpu.memory_space<vmem>>, vector<16x128xf32>
        %cst_83 = arith.constant 1.000000e+00 : f32
        %204 = vector.broadcast %cst_83 : f32 to vector<16x128xf32>
        %205 = arith.subf %204, %196 : vector<16x128xf32>
        %206 = arith.mulf %202, %205 : vector<16x128xf32>
        %cst_84 = arith.constant 9.99999974E-5 : f32
        %207 = vector.broadcast %cst_84 : f32 to vector<16x128xf32>
        %208 = arith.cmpf oge, %206, %207 : vector<16x128xf32>
        %209 = arith.andi %201, %208 : vector<16x128xi1>
        %cst_85 = arith.constant 0.000000e+00 : f32
        %210 = vector.broadcast %cst_85 : f32 to vector<16x128xf32>
        %211 = arith.cmpf ogt, %203, %210 : vector<16x128xf32>
        %212 = arith.andi %209, %211 : vector<16x128xi1>
        %213 = arith.mulf %196, %202 : vector<16x128xf32>
        %cst_86 = arith.constant 0.000000e+00 : f32
        %214 = vector.broadcast %cst_86 : f32 to vector<16x128xf32>
        %215 = arith.select %212, %213, %214 : vector<16x128xi1>, vector<16x128xf32>
        %c0_87 = arith.constant 0 : index
        %c0_88 = arith.constant 0 : index
        %216 = vector.load %arg8[%c0_87, %c0_88] : memref<16x128xf32, #tpu.memory_space<vmem>>, vector<16x128xf32>
        %217 = vector.broadcast %168 : f32 to vector<16x128xf32>
        %218 = arith.mulf %217, %215 : vector<16x128xf32>
        %219 = arith.addf %216, %218 : vector<16x128xf32>
        %c0_89 = arith.constant 0 : index
        %c0_90 = arith.constant 0 : index
        %220 = vector.load %arg8[%c0_89, %c0_90] : memref<16x128xf32, #tpu.memory_space<vmem>>, vector<16x128xf32>
        tpu.vector_store %arg8[%c0_89, %c0_90], %219 {strides = array<i32>} : memref<16x128xf32, #tpu.memory_space<vmem>>, vector<16x128xf32>,
        %c0_91 = arith.constant 0 : index
        %c0_92 = arith.constant 0 : index
        %221 = vector.load %arg9[%c0_91, %c0_92] : memref<16x128xf32, #tpu.memory_space<vmem>>, vector<16x128xf32>
        %222 = vector.broadcast %171 : f32 to vector<16x128xf32>
        %223 = arith.mulf %222, %215 : vector<16x128xf32>
        %224 = arith.addf %221, %223 : vector<16x128xf32>
        %c0_93 = arith.constant 0 : index
        %c0_94 = arith.constant 0 : index
        %225 = vector.load %arg9[%c0_93, %c0_94] : memref<16x128xf32, #tpu.memory_space<vmem>>, vector<16x128xf32>
        tpu.vector_store %arg9[%c0_93, %c0_94], %224 {strides = array<i32>} : memref<16x128xf32, #tpu.memory_space<vmem>>, vector<16x128xf32>,
        %c0_95 = arith.constant 0 : index
        %c0_96 = arith.constant 0 : index
        %226 = vector.load %arg10[%c0_95, %c0_96] : memref<16x128xf32, #tpu.memory_space<vmem>>, vector<16x128xf32>
        %227 = vector.broadcast %174 : f32 to vector<16x128xf32>
        %228 = arith.mulf %227, %215 : vector<16x128xf32>
        %229 = arith.addf %226, %228 : vector<16x128xf32>
        %c0_97 = arith.constant 0 : index
        %c0_98 = arith.constant 0 : index
        %230 = vector.load %arg10[%c0_97, %c0_98] : memref<16x128xf32, #tpu.memory_space<vmem>>, vector<16x128xf32>
        tpu.vector_store %arg10[%c0_97, %c0_98], %229 {strides = array<i32>} : memref<16x128xf32, #tpu.memory_space<vmem>>, vector<16x128xf32>,
        %231 = arith.select %212, %206, %202 : vector<16x128xi1>, vector<16x128xf32>
        %c0_99 = arith.constant 0 : index
        %c0_100 = arith.constant 0 : index
        %232 = vector.load %arg7[%c0_99, %c0_100] : memref<16x128xf32, #tpu.memory_space<vmem>>, vector<16x128xf32>
        tpu.vector_store %arg7[%c0_99, %c0_100], %231 {strides = array<i32>} : memref<16x128xf32, #tpu.memory_space<vmem>>, vector<16x128xf32>,
        %cst_101 = arith.constant dense<true> : vector<16x128xi1>
        %233 = arith.xori %208, %cst_101 : vector<16x128xi1>
        %234 = arith.andi %201, %233 : vector<16x128xi1>
        %cst_102 = arith.constant 0.000000e+00 : f32
        %235 = vector.broadcast %cst_102 : f32 to vector<16x128xf32>
        %236 = arith.select %234, %235, %203 : vector<16x128xi1>, vector<16x128xf32>
        %c0_103 = arith.constant 0 : index
        %c0_104 = arith.constant 0 : index
        %237 = vector.load %arg11[%c0_103, %c0_104] : memref<16x128xf32, #tpu.memory_space<vmem>>, vector<16x128xf32>
        tpu.vector_store %arg11[%c0_103, %c0_104], %236 {strides = array<i32>} : memref<16x128xf32, #tpu.memory_space<vmem>>, vector<16x128xf32>,
      } else {
      }
      %c4_i32_66 = arith.constant 4 : i32
      %125 = arith.muli %arg12, %c4_i32_66 : i32
      %c3_i32 = arith.constant 3 : i32
      %126 = arith.addi %125, %c3_i32 : i32
      %127 = arith.index_cast %30 : i32 to index
      %c9_67 = arith.constant 9 : index
      %128 = arith.index_cast %126 : i32 to index
      %129 = memref.load %arg5[%127, %c9_67, %128] : memref<2x16x256xf32, #tpu.memory_space<smem>>
      %130 = arith.index_cast %30 : i32 to index
      %c10_68 = arith.constant 10 : index
      %131 = arith.index_cast %126 : i32 to index
      %132 = memref.load %arg5[%130, %c10_68, %131] : memref<2x16x256xf32, #tpu.memory_space<smem>>
      %133 = arith.index_cast %30 : i32 to index
      %c11_69 = arith.constant 11 : index
      %134 = arith.index_cast %126 : i32 to index
      %135 = memref.load %arg5[%133, %c11_69, %134] : memref<2x16x256xf32, #tpu.memory_space<smem>>
      %136 = arith.index_cast %30 : i32 to index
      %c12_70 = arith.constant 12 : index
      %137 = arith.index_cast %126 : i32 to index
      %138 = memref.load %arg5[%136, %c12_70, %137] : memref<2x16x256xf32, #tpu.memory_space<smem>>
      %139 = arith.cmpf oge, %132, %3 : f32
      %140 = arith.cmpf ole, %129, %5 : f32
      %141 = arith.andi %139, %140 : i1
      %142 = arith.cmpf oge, %138, %1 : f32
      %143 = arith.andi %141, %142 : i1
      %144 = arith.cmpf ole, %135, %4 : f32
      %145 = arith.andi %143, %144 : i1
      %146 = arith.extui %145 : i1 to i32
      %c0_i32_71 = arith.constant 0 : i32
      %147 = arith.cmpi ne, %146, %c0_i32_71 : i32
      scf.if %147 {
        %148 = arith.index_cast %30 : i32 to index
        %c0_72 = arith.constant 0 : index
        %149 = arith.index_cast %126 : i32 to index
        %150 = memref.load %arg5[%148, %c0_72, %149] : memref<2x16x256xf32, #tpu.memory_space<smem>>
        %151 = arith.index_cast %30 : i32 to index
        %c1_73 = arith.constant 1 : index
        %152 = arith.index_cast %126 : i32 to index
        %153 = memref.load %arg5[%151, %c1_73, %152] : memref<2x16x256xf32, #tpu.memory_space<smem>>
        %154 = arith.index_cast %30 : i32 to index
        %c2_74 = arith.constant 2 : index
        %155 = arith.index_cast %126 : i32 to index
        %156 = memref.load %arg5[%154, %c2_74, %155] : memref<2x16x256xf32, #tpu.memory_space<smem>>
        %157 = arith.index_cast %30 : i32 to index
        %c3 = arith.constant 3 : index
        %158 = arith.index_cast %126 : i32 to index
        %159 = memref.load %arg5[%157, %c3, %158] : memref<2x16x256xf32, #tpu.memory_space<smem>>
        %160 = arith.index_cast %30 : i32 to index
        %c4 = arith.constant 4 : index
        %161 = arith.index_cast %126 : i32 to index
        %162 = memref.load %arg5[%160, %c4, %161] : memref<2x16x256xf32, #tpu.memory_space<smem>>
        %163 = arith.index_cast %30 : i32 to index
        %c5 = arith.constant 5 : index
        %164 = arith.index_cast %126 : i32 to index
        %165 = memref.load %arg5[%163, %c5, %164] : memref<2x16x256xf32, #tpu.memory_space<smem>>
        %166 = arith.index_cast %30 : i32 to index
        %c6 = arith.constant 6 : index
        %167 = arith.index_cast %126 : i32 to index
        %168 = memref.load %arg5[%166, %c6, %167] : memref<2x16x256xf32, #tpu.memory_space<smem>>
        %169 = arith.index_cast %30 : i32 to index
        %c7 = arith.constant 7 : index
        %170 = arith.index_cast %126 : i32 to index
        %171 = memref.load %arg5[%169, %c7, %170] : memref<2x16x256xf32, #tpu.memory_space<smem>>
        %172 = arith.index_cast %30 : i32 to index
        %c8 = arith.constant 8 : index
        %173 = arith.index_cast %126 : i32 to index
        %174 = memref.load %arg5[%172, %c8, %173] : memref<2x16x256xf32, #tpu.memory_space<smem>>
        %175 = vector.broadcast %150 : f32 to vector<16x128xf32>
        %176 = arith.subf %13, %175 : vector<16x128xf32>
        %177 = vector.broadcast %153 : f32 to vector<16x128xf32>
        %178 = arith.subf %9, %177 : vector<16x128xf32>
        %179 = vector.broadcast %156 : f32 to vector<16x128xf32>
        %180 = arith.mulf %179, %176 : vector<16x128xf32>
        %181 = arith.mulf %180, %176 : vector<16x128xf32>
        %182 = vector.broadcast %162 : f32 to vector<16x128xf32>
        %183 = arith.mulf %182, %178 : vector<16x128xf32>
        %184 = arith.mulf %183, %178 : vector<16x128xf32>
        %185 = arith.addf %181, %184 : vector<16x128xf32>
        %cst_75 = arith.constant -5.000000e-01 : f32
        %186 = vector.broadcast %cst_75 : f32 to vector<16x128xf32>
        %187 = arith.mulf %186, %185 : vector<16x128xf32>
        %188 = vector.broadcast %159 : f32 to vector<16x128xf32>
        %189 = arith.mulf %188, %176 : vector<16x128xf32>
        %190 = arith.mulf %189, %178 : vector<16x128xf32>
        %191 = arith.subf %187, %190 : vector<16x128xf32>
        %192 = math.exp %191 : vector<16x128xf32>
        %193 = vector.broadcast %165 : f32 to vector<16x128xf32>
        %194 = arith.mulf %193, %192 : vector<16x128xf32>
        %cst_76 = arith.constant 9.900000e-01 : f32
        %195 = vector.broadcast %cst_76 : f32 to vector<16x128xf32>
        %196 = arith.minimumf %195, %194 : vector<16x128xf32>
        %cst_77 = arith.constant 0.000000e+00 : f32
        %197 = vector.broadcast %cst_77 : f32 to vector<16x128xf32>
        %198 = arith.cmpf ole, %191, %197 : vector<16x128xf32>
        %cst_78 = arith.constant 0.00392156886 : f32
        %199 = vector.broadcast %cst_78 : f32 to vector<16x128xf32>
        %200 = arith.cmpf oge, %196, %199 : vector<16x128xf32>
        %201 = arith.andi %198, %200 : vector<16x128xi1>
        %c0_79 = arith.constant 0 : index
        %c0_80 = arith.constant 0 : index
        %202 = vector.load %arg7[%c0_79, %c0_80] : memref<16x128xf32, #tpu.memory_space<vmem>>, vector<16x128xf32>
        %c0_81 = arith.constant 0 : index
        %c0_82 = arith.constant 0 : index
        %203 = vector.load %arg11[%c0_81, %c0_82] : memref<16x128xf32, #tpu.memory_space<vmem>>, vector<16x128xf32>
        %cst_83 = arith.constant 1.000000e+00 : f32
        %204 = vector.broadcast %cst_83 : f32 to vector<16x128xf32>
        %205 = arith.subf %204, %196 : vector<16x128xf32>
        %206 = arith.mulf %202, %205 : vector<16x128xf32>
        %cst_84 = arith.constant 9.99999974E-5 : f32
        %207 = vector.broadcast %cst_84 : f32 to vector<16x128xf32>
        %208 = arith.cmpf oge, %206, %207 : vector<16x128xf32>
        %209 = arith.andi %201, %208 : vector<16x128xi1>
        %cst_85 = arith.constant 0.000000e+00 : f32
        %210 = vector.broadcast %cst_85 : f32 to vector<16x128xf32>
        %211 = arith.cmpf ogt, %203, %210 : vector<16x128xf32>
        %212 = arith.andi %209, %211 : vector<16x128xi1>
        %213 = arith.mulf %196, %202 : vector<16x128xf32>
        %cst_86 = arith.constant 0.000000e+00 : f32
        %214 = vector.broadcast %cst_86 : f32 to vector<16x128xf32>
        %215 = arith.select %212, %213, %214 : vector<16x128xi1>, vector<16x128xf32>
        %c0_87 = arith.constant 0 : index
        %c0_88 = arith.constant 0 : index
        %216 = vector.load %arg8[%c0_87, %c0_88] : memref<16x128xf32, #tpu.memory_space<vmem>>, vector<16x128xf32>
        %217 = vector.broadcast %168 : f32 to vector<16x128xf32>
        %218 = arith.mulf %217, %215 : vector<16x128xf32>
        %219 = arith.addf %216, %218 : vector<16x128xf32>
        %c0_89 = arith.constant 0 : index
        %c0_90 = arith.constant 0 : index
        %220 = vector.load %arg8[%c0_89, %c0_90] : memref<16x128xf32, #tpu.memory_space<vmem>>, vector<16x128xf32>
        tpu.vector_store %arg8[%c0_89, %c0_90], %219 {strides = array<i32>} : memref<16x128xf32, #tpu.memory_space<vmem>>, vector<16x128xf32>,
        %c0_91 = arith.constant 0 : index
        %c0_92 = arith.constant 0 : index
        %221 = vector.load %arg9[%c0_91, %c0_92] : memref<16x128xf32, #tpu.memory_space<vmem>>, vector<16x128xf32>
        %222 = vector.broadcast %171 : f32 to vector<16x128xf32>
        %223 = arith.mulf %222, %215 : vector<16x128xf32>
        %224 = arith.addf %221, %223 : vector<16x128xf32>
        %c0_93 = arith.constant 0 : index
        %c0_94 = arith.constant 0 : index
        %225 = vector.load %arg9[%c0_93, %c0_94] : memref<16x128xf32, #tpu.memory_space<vmem>>, vector<16x128xf32>
        tpu.vector_store %arg9[%c0_93, %c0_94], %224 {strides = array<i32>} : memref<16x128xf32, #tpu.memory_space<vmem>>, vector<16x128xf32>,
        %c0_95 = arith.constant 0 : index
        %c0_96 = arith.constant 0 : index
        %226 = vector.load %arg10[%c0_95, %c0_96] : memref<16x128xf32, #tpu.memory_space<vmem>>, vector<16x128xf32>
        %227 = vector.broadcast %174 : f32 to vector<16x128xf32>
        %228 = arith.mulf %227, %215 : vector<16x128xf32>
        %229 = arith.addf %226, %228 : vector<16x128xf32>
        %c0_97 = arith.constant 0 : index
        %c0_98 = arith.constant 0 : index
        %230 = vector.load %arg10[%c0_97, %c0_98] : memref<16x128xf32, #tpu.memory_space<vmem>>, vector<16x128xf32>
        tpu.vector_store %arg10[%c0_97, %c0_98], %229 {strides = array<i32>} : memref<16x128xf32, #tpu.memory_space<vmem>>, vector<16x128xf32>,
        %231 = arith.select %212, %206, %202 : vector<16x128xi1>, vector<16x128xf32>
        %c0_99 = arith.constant 0 : index
        %c0_100 = arith.constant 0 : index
        %232 = vector.load %arg7[%c0_99, %c0_100] : memref<16x128xf32, #tpu.memory_space<vmem>>, vector<16x128xf32>
        tpu.vector_store %arg7[%c0_99, %c0_100], %231 {strides = array<i32>} : memref<16x128xf32, #tpu.memory_space<vmem>>, vector<16x128xf32>,
        %cst_101 = arith.constant dense<true> : vector<16x128xi1>
        %233 = arith.xori %208, %cst_101 : vector<16x128xi1>
        %234 = arith.andi %201, %233 : vector<16x128xi1>
        %cst_102 = arith.constant 0.000000e+00 : f32
        %235 = vector.broadcast %cst_102 : f32 to vector<16x128xf32>
        %236 = arith.select %234, %235, %203 : vector<16x128xi1>, vector<16x128xf32>
        %c0_103 = arith.constant 0 : index
        %c0_104 = arith.constant 0 : index
        %237 = vector.load %arg11[%c0_103, %c0_104] : memref<16x128xf32, #tpu.memory_space<vmem>>, vector<16x128xf32>
        tpu.vector_store %arg11[%c0_103, %c0_104], %236 {strides = array<i32>} : memref<16x128xf32, #tpu.memory_space<vmem>>, vector<16x128xf32>,
      } else {
      }
    }
    %c64_i32_32 = arith.constant 64 : i32
    %c1_i32_33 = arith.constant 1 : i32
    %c0_34 = arith.constant 0 : index
    %c0_35 = arith.constant 0 : index
    %42 = vector.load %arg8[%c0_34, %c0_35] : memref<16x128xf32, #tpu.memory_space<vmem>>, vector<16x128xf32>
    %c0_36 = arith.constant 0 : index
    %c0_37 = arith.constant 0 : index
    %c0_38 = arith.constant 0 : index
    %43 = vector.load %arg3[%c0_36, %c0_37, %c0_38] : memref<3x16x128xf32, #tpu.memory_space<vmem>>, vector<1x16x128xf32>
    %44 = vector.shape_cast %43 : vector<1x16x128xf32> to vector<16x128xf32>
    %45 = vector.shape_cast %42 : vector<16x128xf32> to vector<1x16x128xf32>
    tpu.vector_store %arg3[%c0_36, %c0_37, %c0_38], %45 {strides = array<i32>} : memref<3x16x128xf32, #tpu.memory_space<vmem>>, vector<1x16x128xf32>,
    %c0_39 = arith.constant 0 : index
    %c0_40 = arith.constant 0 : index
    %46 = vector.load %arg9[%c0_39, %c0_40] : memref<16x128xf32, #tpu.memory_space<vmem>>, vector<16x128xf32>
    %c1 = arith.constant 1 : index
    %c0_41 = arith.constant 0 : index
    %c0_42 = arith.constant 0 : index
    %47 = vector.load %arg3[%c1, %c0_41, %c0_42] : memref<3x16x128xf32, #tpu.memory_space<vmem>>, vector<1x16x128xf32>
    %48 = vector.shape_cast %47 : vector<1x16x128xf32> to vector<16x128xf32>
    %49 = vector.shape_cast %46 : vector<16x128xf32> to vector<1x16x128xf32>
    tpu.vector_store %arg3[%c1, %c0_41, %c0_42], %49 {strides = array<i32>} : memref<3x16x128xf32, #tpu.memory_space<vmem>>, vector<1x16x128xf32>,
    %c0_43 = arith.constant 0 : index
    %c0_44 = arith.constant 0 : index
    %50 = vector.load %arg10[%c0_43, %c0_44] : memref<16x128xf32, #tpu.memory_space<vmem>>, vector<16x128xf32>
    %c2 = arith.constant 2 : index
    %c0_45 = arith.constant 0 : index
    %c0_46 = arith.constant 0 : index
    %51 = vector.load %arg3[%c2, %c0_45, %c0_46] : memref<3x16x128xf32, #tpu.memory_space<vmem>>, vector<1x16x128xf32>
    %52 = vector.shape_cast %51 : vector<1x16x128xf32> to vector<16x128xf32>
    %53 = vector.shape_cast %50 : vector<16x128xf32> to vector<1x16x128xf32>
    tpu.vector_store %arg3[%c2, %c0_45, %c0_46], %53 {strides = array<i32>} : memref<3x16x128xf32, #tpu.memory_space<vmem>>, vector<1x16x128xf32>,
    %c0_47 = arith.constant 0 : index
    %c0_48 = arith.constant 0 : index
    %54 = vector.load %arg7[%c0_47, %c0_48] : memref<16x128xf32, #tpu.memory_space<vmem>>, vector<16x128xf32>
    %c0_49 = arith.constant 0 : index
    %c0_50 = arith.constant 0 : index
    %55 = vector.load %arg4[%c0_49, %c0_50] : memref<16x128xf32, #tpu.memory_space<vmem>>, vector<16x128xf32>
    tpu.vector_store %arg4[%c0_49, %c0_50], %54 {strides = array<i32>} : memref<16x128xf32, #tpu.memory_space<vmem>>, vector<16x128xf32>,
    return
  }
  func.func @transform_1(%arg0: i32, %arg1: i32) -> (i32, i32, i32) {
    %c0_i32 = arith.constant 0 : i32
    %c0_i32_0 = arith.constant 0 : i32
    return %c0_i32, %arg0, %arg1 : i32, i32, i32
  }
  func.func @transform_2(%arg0: i32, %arg1: i32) -> (i32, i32) {
    %c0_i32 = arith.constant 0 : i32
    return %arg0, %arg1 : i32, i32
  }
}

</mosaic_0001>

<bundles_post_ra>
// kernel: tpu_custom_call.1
= control target key start
LH: loop header
LB: loop body
LE: loop exit
PB: predicated region body
PF: predicated region fallthrough
CT: control target
= control target key end

     0   :  { %s1588_s0 = inlined_call_operand.hbm [shape: f32[1,16,256], index: 0, kind: input, shape index: {}]   ;;  %s1589_s1 = inlined_call_operand.hbm [shape: f32[3,32,128], index: 1, kind: output, shape index: {0}]   ;;  %s1590_s2 = inlined_call_operand.hbm [shape: f32[32,128], index: 2, kind: output, shape index: {1}]  }
   0x1   :  { %1594 = sst [smem:[#allocation26_spill]] %s1588_s0 }
   0x2   :  { %8 = vsyncpa [#allocation10], 0 }
   0x3   :  { %10 = vsyncpa [#allocation10 + $0x1], 0 }
   0x4   :  { %11 = vsyncpa [#allocation12], 0 }
   0x5   :  { %13 = vsyncpa [#allocation12 + $0x1], 0  ;;  %s1166_s9 = smov 0   ;;  %s1168_s10 = smov 0  }
   0x6   :  { %s1170_s11 = smov 0   ;;  %s1172_s12 = smov 0  }
   0x7 LB: > { %1595 = sst [smem:[#allocation22_spill]] %s1120_s10  ;;  %s28_s13 = sadd.s32 1, %s1124_s11  ;;  %s1128_s12 = sphi %s1172_s12, %s19_s12   ;;  %s1124_s11 = sphi %s1170_s11, %s1629_s11   ;;  %s1120_s10 = sphi %s1168_s10, %s1628_s10   ;;  %s1116_s9 = sphi %s1166_s9, %s1627_s9  }
   0x8   : > { %s921_s14 = sadd.s32 4294967295, %s1128_s12   ;;  %p30_p0 = scmp.ge.s32.totalorder %s28_s13, 2 }
   0x9   : > { %p46_p1 = scmp.ne.s32.totalorder %s1120_s10, %s1116_s9  ;;  %s37_s15 = sadd.s32 1, %s1120_s10 }
   0xa   : > { %s1631_s13 = smov (%p30_p0, %s28_s13), 0  ;;  %p47_p2 = scmp.eq.s32.totalorder %s921_s14, 1 }
   0xb   : > { %1596 = sst [smem:[#allocation23_spill]] %s1631_s13  ;;  %s32_s16 = ssub.s32 %s1124_s11, %s1631_s13 }
   0xc   : > { %p41_p3 = scmp.eq.s32.totalorder %s1128_s12, 1  ;;  %p35_p4 = scmp.eq.s32.totalorder %s32_s16, 0 }
   0xd   : > { %p922_p5 = scmp.ne.s32.totalorder %s32_s16, 0  ;;  %p1196_p6 = por %p47_p2, %p46_p1 }
   0xe   : > { %s1201_s18 = scalar_select %p35_p4, %s1120_s10, %s37_s15  }
   0xf   : > { %s1597_s17 = scalar_select %p1196_p6, 1, 0 }
  0x10   : > { %1599 = sst [smem:[#allocation25_spill]] %s1201_s18  ;;  %p1203_p7 = por %p922_p5, %p41_p3 }
  0x11   : > { %1598 = sst [smem:[#allocation24_spill]] %s1597_s17  ;;  %p924_p8 = scmp.ge.s32.totalorder %s1128_s12, 2 }
  0x12   : > { %s1209_s20 = sand.u32 (!%p924_p8), 1, %s1120_s10   ;;  %s926_s21 = sshll.u32 (!%p924_p8), %s1124_s11, 4 }
  0x13   : > { %77 = sbr.rel (%p924_p8) target bundleno = 395 (0x18b), region = 12  ;;  %s925_s23 = sshll.u32 (!%p924_p8), %s1209_s20, 4 }
  0x14   : > { %s959_s22 = smul.u32 (!%p924_p8), 48, %s1209_s20  ;;  %s1214_s24 = scvt.s32.f32 (!%p924_p8), %s926_s21 }
  0x15   : > { %s1136_s26 = smov (!%p924_p8), [#allocation2]   ;;  %s1601_s0 = sld [smem:[#allocation26_spill]] (!%p924_p8) }
  0x16   : > { %s1217_s25 = sadd.f32 (!%p924_p8), 15.0, %s1214_s24  ;;  %s1229_s29 = scalar_lea.vmem (!%p924_p8), [#allocation9], %s959_s22 }
  0x17   : > { %s1231_s30 = scalar_lea.vmem (!%p924_p8), [#allocation11], %s925_s23 }
  0x18   : > { %v100_v0 = vlaneseq  ;;  %v1134_v1 = vmov 1.0   ;;  %v1135_v2 = vmov 0.0   ;;  %v105_v7 = vstv %s1214_s24 }
  0x19   : > { %113 = vst [vmem:[#allocation4] sm:$0xff] %v1134_v1  ;;  %114 = vst [vmem:[#allocation4 + $0x8] sm:$0xff] %v1134_v1 }
  0x1a   : > { %121 = vst [vmem:[#allocation8] sm:$0xff] %v1134_v1  ;;  %122 = vst [vmem:[#allocation8 + $0x8] sm:$0xff] %v1134_v1  ;;  %v101_v3 = vshrl.u32 %v100_v0, 7  ;;  %v109_v4 = vand.u32 127, %v100_v0 }
  0x1b   : > { %115 = vst [vmem:[#allocation5 + $0x8] sm:$0xff] %v1135_v2  ;;  %116 = vst [vmem:[#allocation5] sm:$0xff] %v1135_v2  ;;  %131 = dma.hbm_to_smem %s1601_s0, 512, %s1136_s26, [#allocation3] }
  0x1c   : > { %117 = vst [vmem:[#allocation6 + $0x8] sm:$0xff] %v1135_v2  ;;  %118 = vst [vmem:[#allocation6] sm:$0xff] %v1135_v2  ;;  %v102_v5 = vadd.s32 8, %v101_v3  ;;  %v103_v6 = vcvt.s32.f32 %v101_v3  ;;  %v1220_v8 = vcvt.s32.f32 %v109_v4 }
  0x1d   : > { %119 = vst [vmem:[#allocation7] sm:$0xff] %v1135_v2  ;;  %120 = vst [vmem:[#allocation7 + $0x8] sm:$0xff] %v1135_v2 }
  0x1e   : > { %v104_v9 = vcvt.s32.f32 %v102_v5  ;;  %v1225_v10 = vadd.f32 %v105_v7, %v103_v6 }
  0x20   : > { %v1227_v11 = vadd.f32 %v105_v7, %v104_v9 }
  0x21   : > { %1104 = dma.done.wait [#allocation3], 512 }
  0x22   : > { %1105 = vsyncadd [#allocation3], 4294966784 }
  0x23   : > { %136 = sfence }
  0x24   : > { %s1233_s3 = smov 0  }
  0x25 LB: >> { %s1239_s4 = sshll.u32 %s1132_s3, 2  ;;  %s1132_s3 = sphi %s1233_s3, %s142_s3  }
  0x26   : >> { %s144_s5 = sshra.s32 %s1239_s4, 7  ;;  %s1243_s6 = sand.u32 127, %s1239_s4 }
  0x27   : >> { %s1245_s7 = sshll.u32 %s144_s5, 10  ;;  %s150_s8 = sadd.s32 128, %s1243_s6 }
  0x28   : >> { %s1249_s14 = sadd.s32 2048, %s1245_s7  ;;  %s153_s15 = sadd.s32 256, %s1243_s6 }
  0x29   : >> { %s151_s16 = sadd.s32 %s1249_s14, %s150_s8  ;;  %s154_s21 = sadd.s32 %s1249_s14, %s153_s15 }
  0x2a   : >> { %s152_s22 = sld [smem:[#allocation2 + %s151_s16]]  ;;  %s156_s23 = sadd.s32 384, %s1243_s6 }
  0x2b   : >> { %s155_s26 = sld [smem:[#allocation2 + %s154_s21]]  ;;  %s157_s27 = sadd.s32 %s1249_s14, %s156_s23 }
  0x2c   : >> { %s159_s28 = sadd.s32 512, %s1243_s6  ;;  %s158_s13 = sld [smem:[#allocation2 + %s157_s27]] }
  0x2d   : >> { %s160_s5 = sadd.s32 %s1249_s14, %s159_s28 }
  0x2e   : >> { %s161_s0 = sld [smem:[#allocation2 + %s160_s5]] }
  0x30   : >> { %p163_p9 = scmp.le.f32.partialorder %s152_s22, 127.0 }
  0x31   : >> { %p162_p10 = scmp.ge.f32.partialorder %s155_s26, 0.0 }
  0x32   : >> { %p169_p1 = scmp.le.f32.partialorder %s158_s13, %s1217_s25 }
  0x33   : >> { %p164_p11 = pnand %p163_p9, %p162_p10 }
  0x34   : >> { %p166_p12 = scmp.ge.f32.partialorder %s161_s0, %s1214_s24 }
  0x35   : >> { %p165_p13 = pneg %p164_p11 }
  0x37   : >> { %p167_p0 = pnand %p166_p12, %p165_p13 }
  0x39   : >> { %p168_p2 = pneg %p167_p0 }
  0x3b   : >> { %p170_p3 = pnand %p169_p1, %p168_p2 }
  0x3c   : >> { %s175_s16 = sadd.s32 (!%p170_p3), %s1245_s7, %s1243_s6  ;;  %s177_s21 = sadd.s32 (!%p170_p3), %s1245_s7, %s150_s8 }
  0x3d   : >> { %173 = sbr.rel (%p170_p3) target bundleno = 119 (0x77), region = 27  ;;  %s176_s5 = sld [smem:[#allocation2 + %s175_s16]] (!%p170_p3) }
  0x3e   : >> { %s179_s27 = sadd.s32 (!%p170_p3), %s1245_s7, %s153_s15  ;;  %s178_s22 = sld [smem:[#allocation2 + %s177_s21]] (!%p170_p3) }
  0x3f   : >> { %s181_s26 = sadd.s32 (!%p170_p3), %s1245_s7, %s156_s23  ;;  %s180_s18 = sld [smem:[#allocation2 + %s179_s27]] (!%p170_p3) }
  0x40   : >> { %s183_s0 = sadd.s32 (!%p170_p3), %s1245_s7, %s159_s28  ;;  %s182_s10 = sld [smem:[#allocation2 + %s181_s26]] (!%p170_p3) }
  0x41   : >> { %s184_s17 = sld [smem:[#allocation2 + %s183_s0]] (!%p170_p3)  ;;  %s191_s8 = sadd.s32 (!%p170_p3), 896, %s1243_s6 }
  0x42   : >> { %s192_s23 = sadd.s32 %s1245_s7, %s191_s8  ;;  %s194_s28 = sadd.s32 %s1249_s14, %s1243_s6  ;;  %v234_v43 = vld [vmem:[#allocation4] sm:$0xff]  ;;  %v235_v47 = vld [vmem:[#allocation4 + $0x8] sm:$0xff]  ;;  %v254_v60 = vld [vmem:[#allocation5 + $0x8] sm:$0xff]  ;;  %vm1137_vm14 = vmmov 1  }
  0x43   : >> { %v196_v12 = vstv %s176_s5  ;;  %s1279_s21 = sld [smem:[#allocation2 + %s192_s23]]  ;;  %v236_v45 = vld [vmem:[#allocation8] sm:$0xff]  ;;  %v237_v48 = vld [vmem:[#allocation8 + $0x8] sm:$0xff]  ;;  %v272_v2 = vld [vmem:[#allocation7] sm:$0xff] }
  0x44   : >> { %v197_v13 = vsub.f32 %v1220_v8, %v196_v12  ;;  %v198_v14 = vstv %s178_s22  ;;  %s1281_s5 = sld [smem:[#allocation2 + %s194_s28]]  ;;  %vm246_vm5 = vcmp.gt.f32.partialorder %v236_v45, 0.0  ;;  %vm247_vm8 = vcmp.gt.f32.partialorder %v237_v48, 0.0  ;;  %v263_v61 = vld [vmem:[#allocation6 + $0x8] sm:$0xff]  ;;  %v255_v5 = vld [vmem:[#allocation5] sm:$0xff]  ;;  %v264_v6 = vld [vmem:[#allocation6] sm:$0xff] }
  0x45   : >> { %v199_v15 = vsub.f32 %v1225_v10, %v198_v14  ;;  %v201_v16 = vstv %s180_s18  ;;  %v200_v17 = vsub.f32 %v1227_v11, %v198_v14  ;;  %s188_s18 = sadd.s32 768, %s1243_s6 }
  0x46   : >> { %v202_v18 = vmul.f32 %v201_v16, %v197_v13  ;;  %v213_v19 = vstv %s182_s10  ;;  %s185_s10 = sadd.s32 640, %s1243_s6  ;;  %s189_s15 = sadd.s32 %s1245_s7, %s188_s18 }
  0x47   : >> { %v204_v20 = vstv %s184_s17  ;;  %v214_v23 = vmul.f32 %v213_v19, %v197_v13  ;;  %s186_s13 = sadd.s32 %s1245_s7, %s185_s10  ;;  %s1277_s16 = sld [smem:[#allocation2 + %s189_s15]] }
  0x48   : >> { %v203_v21 = vmul.f32 %v202_v18, %v197_v13  ;;  %v205_v22 = vmul.f32 %v204_v20, %v199_v15  ;;  %v206_v24 = vmul.f32 %v204_v20, %v200_v17  ;;  %s187_s17 = sld [smem:[#allocation2 + %s186_s13]] }
  0x49   : >> { %v215_v28 = vmul.f32 %v214_v23, %v199_v15  ;;  %v216_v30 = vmul.f32 %v214_v23, %v200_v17  ;;  %v265_v57 = vstv %s1279_s21 }
  0x4a   : >> { %v207_v25 = vmul.f32 %v205_v22, %v199_v15  ;;  %v208_v26 = vmul.f32 %v206_v24, %v200_v17  ;;  %v274_v58 = vstv %s1281_s5  ;;  %v273_v15 = vld [vmem:[#allocation7 + $0x8] sm:$0xff] }
  0x4c   : >> { %v209_v27 = vadd.f32 %v207_v25, %v203_v21  ;;  %v210_v29 = vadd.f32 %v208_v26, %v203_v21 }
  0x4d   : >> { %v256_v54 = vstv %s1277_s16 }
  0x4e   : >> { %v211_v31 = vmul.f32 -0.5, %v209_v27  ;;  %v212_v32 = vmul.f32 -0.5, %v210_v29  ;;  %v223_v37 = vstv %s187_s17 }
  0x50   : >> { %v217_v33 = vsub.f32 %v211_v31, %v215_v28  ;;  %v218_v34 = vsub.f32 %v212_v32, %v216_v30 }
  0x52   : >> { %v219_v35 = vmul.f32 1.442695, %v217_v33  ;;  %v221_v36 = vmul.f32 1.442695, %v218_v34  ;;  %vm228_vm0 = vcmp.le.f32.partialorder %v217_v33, 0.0  ;;  %vm229_vm2 = vcmp.le.f32.partialorder %v218_v34, 0.0 }
  0x54   : >> { %1034 = vpow2.f32 %v219_v35 }
  0x55   : >> { %1036 = vpow2.f32 %v221_v36 }
  0x61   : >> { %v1035_v38 = vpop.eup %1034 }
  0x62   : >> { %v1037_v39 = vpop.eup %1036  ;;  %v224_v40 = vmul.f32 %v1035_v38, %v223_v37 }
  0x63   : >> { %v225_v41 = vmul.f32 %v1037_v39, %v223_v37 }
  0x64   : >> { %v226_v42 = vmin.f32 %v224_v40, 0.99 }
  0x65   : >> { %v227_v44 = vmin.f32 %v225_v41, 0.99 }
  0x66   : >> { %vm230_vm1 = vcmp.ge.f32.partialorder %v226_v42, 0.003921569  ;;  %v238_v46 = vsub.f32 1.0, %v226_v42  ;;  %v250_v52 = vmul.f32 %v234_v43, %v226_v42 }
  0x67   : >> { %vm231_vm3 = vcmp.ge.f32.partialorder %v227_v44, 0.003921569  ;;  %v239_v49 = vsub.f32 1.0, %v227_v44  ;;  %vm1283_vm4 = vmand %vm228_vm0, %vm230_vm1  ;;  %v251_v56 = vmul.f32 %v235_v47, %v227_v44 }
  0x68   : >> { %v240_v51 = vmul.f32 %v238_v46, %v234_v43  ;;  %vm1288_vm7 = vmand %vm229_vm2, %vm231_vm3 }
  0x69   : >> { %v241_v53 = vmul.f32 %v239_v49, %v235_v47 }
  0x6a   : >> { %vm242_vm6 = vcmp.ge.f32.partialorder %v240_v51, 0.0001 }
  0x6b   : >> { %vm244_vm9 = vmand %vm1283_vm4, %vm242_vm6  ;;  %vm243_vm10 = vcmp.ge.f32.partialorder %v241_v53, 0.0001 }
  0x6c   : >> { %vm248_vm11 = vmand %vm244_vm9, %vm246_vm5 }
  0x6d   : >> { %v252_v59 = vsel %vm248_vm11, %v250_v52, 0.0  ;;  %vm245_vm12 = vmand %vm1288_vm7, %vm243_vm10  ;;  %v281_v62 = vsel %vm248_vm11, %v240_v51, %v234_v43 }
  0x6e   : >> { %v257_v63 = vmul.f32 %v256_v54, %v252_v59  ;;  %vm1300_vm13 = vmand %vm245_vm12, %vm247_vm8  ;;  %v266_v1 = vmul.f32 %v265_v57, %v252_v59  ;;  %v275_v3 = vmul.f32 %v274_v58, %v252_v59  ;;  %283 = vst [vmem:[#allocation4] sm:$0xff] %v281_v62 }
  0x6f   : >> { %v253_v4 = vsel %vm1300_vm13, %v251_v56, 0.0  ;;  %v282_v7 = vsel %vm1300_vm13, %v241_v53, %v235_v47  ;;  %vm285_vm15 = vmxor %vm242_vm6, %vm1137_vm14 }
  0x70   : >> { %v259_v9 = vadd.f32 %v257_v63, %v254_v60  ;;  %v258_v12 = vmul.f32 %v256_v54, %v253_v4  ;;  %v268_v13 = vadd.f32 %v266_v1, %v263_v61  ;;  %v267_v14 = vmul.f32 %v265_v57, %v253_v4  ;;  %284 = vst [vmem:[#allocation4 + $0x8] sm:$0xff] %v282_v7  ;;  %vm287_vm0 = vmand %vm1283_vm4, %vm285_vm15 }
  0x71   : >> { %v277_v16 = vadd.f32 %v275_v3, %v272_v2  ;;  %v276_v17 = vmul.f32 %v274_v58, %v253_v4  ;;  %v289_v18 = vsel %vm287_vm0, 0.0, %v236_v45  ;;  %vm286_vm1 = vmxor %vm243_vm10, %vm1137_vm14 }
  0x72   : >> { %261 = vst [vmem:[#allocation5 + $0x8] sm:$0xff] %v259_v9  ;;  %v260_v19 = vadd.f32 %v258_v12, %v255_v5  ;;  %270 = vst [vmem:[#allocation6 + $0x8] sm:$0xff] %v268_v13  ;;  %v269_v20 = vadd.f32 %v267_v14, %v264_v6 }
  0x73   : >> { %291 = vst [vmem:[#allocation8] sm:$0xff] %v289_v18  ;;  %vm288_vm2 = vmand %vm1288_vm7, %vm286_vm1  ;;  %v278_v21 = vadd.f32 %v276_v17, %v273_v15 }
  0x74   : >> { %279 = vst [vmem:[#allocation7] sm:$0xff] %v277_v16  ;;  %v290_v22 = vsel %vm288_vm2, 0.0, %v237_v48  ;;  %262 = vst [vmem:[#allocation5] sm:$0xff] %v260_v19 }
  0x75   : >> { %271 = vst [vmem:[#allocation6] sm:$0xff] %v269_v20  ;;  %292 = vst [vmem:[#allocation8 + $0x8] sm:$0xff] %v290_v22 }
  0x76   : >> { %280 = vst [vmem:[#allocation7 + $0x8] sm:$0xff] %v278_v21 }
  0x77 PF: >> { %s293_s6 = sadd.s32 1, %s1239_s4 }
  0x78   : >> { %s294_s7 = sshra.s32 %s293_s6, 7  ;;  %s1315_s14 = sand.u32 127, %s293_s6 }
  0x79   : >> { %s1317_s27 = sshll.u32 %s294_s7, 10  ;;  %s300_s22 = sadd.s32 128, %s1315_s14 }
  0x7a   : >> { %s1321_s26 = sadd.s32 2048, %s1317_s27  ;;  %s303_s0 = sadd.s32 256, %s1315_s14 }
  0x7b   : >> { %s301_s10 = sadd.s32 %s1321_s26, %s300_s22  ;;  %s304_s13 = sadd.s32 %s1321_s26, %s303_s0 }
  0x7c   : >> { %s302_s17 = sld [smem:[#allocation2 + %s301_s10]]  ;;  %s306_s18 = sadd.s32 384, %s1315_s14 }
  0x7d   : >> { %s305_s8 = sld [smem:[#allocation2 + %s304_s13]]  ;;  %s307_s15 = sadd.s32 %s1321_s26, %s306_s18 }
  0x7e   : >> { %s309_s23 = sadd.s32 512, %s1315_s14  ;;  %s308_s21 = sld [smem:[#allocation2 + %s307_s15]] }
  0x7f   : >> { %s310_s28 = sadd.s32 %s1321_s26, %s309_s23 }
  0x80   : >> { %s311_s16 = sld [smem:[#allocation2 + %s310_s28]] }
  0x82   : >> { %p313_p4 = scmp.le.f32.partialorder %s302_s17, 127.0 }
  0x83   : >> { %p312_p5 = scmp.ge.f32.partialorder %s305_s8, 0.0 }
  0x84   : >> { %p319_p12 = scmp.le.f32.partialorder %s308_s21, %s1217_s25 }
  0x85   : >> { %p314_p8 = pnand %p313_p4, %p312_p5 }
  0x86   : >> { %p316_p9 = scmp.ge.f32.partialorder %s311_s16, %s1214_s24 }
  0x87   : >> { %p315_p10 = pneg %p314_p8 }
  0x89   : >> { %p317_p11 = pnand %p316_p9, %p315_p10 }
  0x8b   : >> { %p318_p13 = pneg %p317_p11 }
  0x8d   : >> { %p320_p0 = pnand %p319_p12, %p318_p13 }
  0x8e   : >> { %s325_s5 = sadd.s32 (!%p320_p0), %s1317_s27, %s1315_s14  ;;  %s327_s6 = sadd.s32 (!%p320_p0), %s1317_s27, %s300_s22 }
  0x8f   : >> { %323 = sbr.rel (%p320_p0) target bundleno = 201 (0xc9), region = 31  ;;  %s326_s7 = sld [smem:[#allocation2 + %s325_s5]] (!%p320_p0) }
  0x90   : >> { %s329_s10 = sadd.s32 (!%p320_p0), %s1317_s27, %s303_s0  ;;  %s328_s13 = sld [smem:[#allocation2 + %s327_s6]] (!%p320_p0) }
  0x91   : >> { %s331_s17 = sadd.s32 (!%p320_p0), %s1317_s27, %s306_s18  ;;  %s330_s8 = sld [smem:[#allocation2 + %s329_s10]] (!%p320_p0) }
  0x92   : >> { %s333_s15 = sadd.s32 (!%p320_p0), %s1317_s27, %s309_s23  ;;  %s332_s28 = sld [smem:[#allocation2 + %s331_s17]] (!%p320_p0) }
  0x93   : >> { %s334_s16 = sld [smem:[#allocation2 + %s333_s15]] (!%p320_p0)  ;;  %s335_s22 = sadd.s32 (!%p320_p0), 640, %s1315_s14 }
  0x94   : >> { %s336_s0 = sadd.s32 %s1317_s27, %s335_s22  ;;  %s338_s23 = sadd.s32 768, %s1315_s14  ;;  %v384_v54 = vld [vmem:[#allocation4] sm:$0xff]  ;;  %v385_v58 = vld [vmem:[#allocation4 + $0x8] sm:$0xff]  ;;  %v404_v7 = vld [vmem:[#allocation5 + $0x8] sm:$0xff]  ;;  %vm1138_vm1 = vmmov 1  }
  0x95   : >> { %v346_v23 = vstv %s326_s7  ;;  %s337_s18 = sld [smem:[#allocation2 + %s336_s0]]  ;;  %s341_s21 = sadd.s32 896, %s1315_s14  ;;  %v386_v56 = vld [vmem:[#allocation8] sm:$0xff]  ;;  %v387_v59 = vld [vmem:[#allocation8 + $0x8] sm:$0xff]  ;;  %v422_v16 = vld [vmem:[#allocation7] sm:$0xff] }
  0x96   : >> { %v347_v24 = vsub.f32 %v1220_v8, %v346_v23  ;;  %v348_v25 = vstv %s328_s13  ;;  %s339_s5 = sadd.s32 %s1317_s27, %s338_s23  ;;  %s342_s6 = sadd.s32 %s1317_s27, %s341_s21  ;;  %vm396_vm8 = vcmp.gt.f32.partialorder %v386_v56, 0.0  ;;  %vm397_vm11 = vcmp.gt.f32.partialorder %v387_v59, 0.0  ;;  %v413_v9 = vld [vmem:[#allocation6 + $0x8] sm:$0xff]  ;;  %v405_v19 = vld [vmem:[#allocation5] sm:$0xff]  ;;  %v414_v20 = vld [vmem:[#allocation6] sm:$0xff] }
  0x97   : >> { %v349_v26 = vsub.f32 %v1225_v10, %v348_v25  ;;  %v351_v27 = vstv %s330_s8  ;;  %v350_v28 = vsub.f32 %v1227_v11, %v348_v25  ;;  %s344_s7 = sadd.s32 %s1321_s26, %s1315_s14  ;;  %s1349_s10 = sld [smem:[#allocation2 + %s339_s5]] }
  0x98   : >> { %v352_v29 = vmul.f32 %v351_v27, %v347_v24  ;;  %v363_v30 = vstv %s332_s28  ;;  %s1351_s13 = sld [smem:[#allocation2 + %s342_s6]] }
  0x99   : >> { %v354_v31 = vstv %s334_s16  ;;  %v364_v34 = vmul.f32 %v363_v30, %v347_v24  ;;  %s1353_s17 = sld [smem:[#allocation2 + %s344_s7]] }
  0x9a   : >> { %v353_v32 = vmul.f32 %v352_v29, %v347_v24  ;;  %v355_v33 = vmul.f32 %v354_v31, %v349_v26  ;;  %v356_v35 = vmul.f32 %v354_v31, %v350_v28 }
  0x9b   : >> { %v365_v39 = vmul.f32 %v364_v34, %v349_v26  ;;  %v366_v41 = vmul.f32 %v364_v34, %v350_v28  ;;  %v373_v48 = vstv %s337_s18 }
  0x9c   : >> { %v357_v36 = vmul.f32 %v355_v33, %v349_v26  ;;  %v358_v37 = vmul.f32 %v356_v35, %v350_v28  ;;  %v423_v26 = vld [vmem:[#allocation7 + $0x8] sm:$0xff] }
  0x9d   : >> { %v406_v1 = vstv %s1349_s10 }
  0x9e   : >> { %v359_v38 = vadd.f32 %v357_v36, %v353_v32  ;;  %v360_v40 = vadd.f32 %v358_v37, %v353_v32  ;;  %v415_v4 = vstv %s1351_s13 }
  0x9f   : >> { %v424_v5 = vstv %s1353_s17 }
  0xa0   : >> { %v361_v42 = vmul.f32 -0.5, %v359_v38  ;;  %v362_v43 = vmul.f32 -0.5, %v360_v40 }
  0xa2   : >> { %v367_v44 = vsub.f32 %v361_v42, %v365_v39  ;;  %v368_v45 = vsub.f32 %v362_v43, %v366_v41 }
  0xa4   : >> { %v369_v46 = vmul.f32 1.442695, %v367_v44  ;;  %v371_v47 = vmul.f32 1.442695, %v368_v45  ;;  %vm378_vm3 = vcmp.le.f32.partialorder %v367_v44, 0.0  ;;  %vm379_vm5 = vcmp.le.f32.partialorder %v368_v45, 0.0 }
  0xa6   : >> { %1038 = vpow2.f32 %v369_v46 }
  0xa7   : >> { %1040 = vpow2.f32 %v371_v47 }
  0xb3   : >> { %v1039_v49 = vpop.eup %1038 }
  0xb4   : >> { %v1041_v50 = vpop.eup %1040  ;;  %v374_v51 = vmul.f32 %v1039_v49, %v373_v48 }
  0xb5   : >> { %v375_v52 = vmul.f32 %v1041_v50, %v373_v48 }
  0xb6   : >> { %v376_v53 = vmin.f32 %v374_v51, 0.99 }
  0xb7   : >> { %v377_v55 = vmin.f32 %v375_v52, 0.99 }
  0xb8   : >> { %vm380_vm4 = vcmp.ge.f32.partialorder %v376_v53, 0.003921569  ;;  %v388_v57 = vsub.f32 1.0, %v376_v53  ;;  %v400_v63 = vmul.f32 %v384_v54, %v376_v53 }
  0xb9   : >> { %vm381_vm6 = vcmp.ge.f32.partialorder %v377_v55, 0.003921569  ;;  %v389_v60 = vsub.f32 1.0, %v377_v55  ;;  %vm1355_vm7 = vmand %vm378_vm3, %vm380_vm4  ;;  %v401_v3 = vmul.f32 %v385_v58, %v377_v55 }
  0xba   : >> { %v390_v62 = vmul.f32 %v388_v57, %v384_v54  ;;  %vm1360_vm10 = vmand %vm379_vm5, %vm381_vm6 }
  0xbb   : >> { %v391_v0 = vmul.f32 %v389_v60, %v385_v58 }
  0xbc   : >> { %vm392_vm9 = vcmp.ge.f32.partialorder %v390_v62, 0.0001 }
  0xbd   : >> { %vm394_vm12 = vmand %vm1355_vm7, %vm392_vm9  ;;  %vm393_vm13 = vcmp.ge.f32.partialorder %v391_v0, 0.0001 }
  0xbe   : >> { %vm398_vm14 = vmand %vm394_vm12, %vm396_vm8 }
  0xbf   : >> { %v402_v6 = vsel %vm398_vm14, %v400_v63, 0.0  ;;  %vm395_vm15 = vmand %vm1360_vm10, %vm393_vm13  ;;  %v431_v12 = vsel %vm398_vm14, %v390_v62, %v384_v54 }
  0xc0   : >> { %v407_v13 = vmul.f32 %v406_v1, %v402_v6  ;;  %vm1372_vm0 = vmand %vm395_vm15, %vm397_vm11  ;;  %v416_v15 = vmul.f32 %v415_v4, %v402_v6  ;;  %v425_v17 = vmul.f32 %v424_v5, %v402_v6  ;;  %433 = vst [vmem:[#allocation4] sm:$0xff] %v431_v12 }
  0xc1   : >> { %v403_v18 = vsel %vm1372_vm0, %v401_v3, 0.0  ;;  %v432_v21 = vsel %vm1372_vm0, %v391_v0, %v385_v58  ;;  %vm435_vm2 = vmxor %vm392_vm9, %vm1138_vm1 }
  0xc2   : >> { %v409_v22 = vadd.f32 %v407_v13, %v404_v7  ;;  %v408_v23 = vmul.f32 %v406_v1, %v403_v18  ;;  %v418_v24 = vadd.f32 %v416_v15, %v413_v9  ;;  %v417_v25 = vmul.f32 %v415_v4, %v403_v18  ;;  %434 = vst [vmem:[#allocation4 + $0x8] sm:$0xff] %v432_v21  ;;  %vm437_vm3 = vmand %vm1355_vm7, %vm435_vm2 }
  0xc3   : >> { %v427_v27 = vadd.f32 %v425_v17, %v422_v16  ;;  %v426_v28 = vmul.f32 %v424_v5, %v403_v18  ;;  %v439_v29 = vsel %vm437_vm3, 0.0, %v386_v56  ;;  %vm436_vm4 = vmxor %vm393_vm13, %vm1138_vm1 }
  0xc4   : >> { %411 = vst [vmem:[#allocation5 + $0x8] sm:$0xff] %v409_v22  ;;  %v410_v30 = vadd.f32 %v408_v23, %v405_v19  ;;  %420 = vst [vmem:[#allocation6 + $0x8] sm:$0xff] %v418_v24  ;;  %v419_v31 = vadd.f32 %v417_v25, %v414_v20 }
  0xc5   : >> { %441 = vst [vmem:[#allocation8] sm:$0xff] %v439_v29  ;;  %vm438_vm5 = vmand %vm1360_vm10, %vm436_vm4  ;;  %v428_v32 = vadd.f32 %v426_v28, %v423_v26 }
  0xc6   : >> { %429 = vst [vmem:[#allocation7] sm:$0xff] %v427_v27  ;;  %v440_v33 = vsel %vm438_vm5, 0.0, %v387_v59  ;;  %412 = vst [vmem:[#allocation5] sm:$0xff] %v410_v30 }
  0xc7   : >> { %421 = vst [vmem:[#allocation6] sm:$0xff] %v419_v31  ;;  %442 = vst [vmem:[#allocation8 + $0x8] sm:$0xff] %v440_v33 }
  0xc8   : >> { %430 = vst [vmem:[#allocation7 + $0x8] sm:$0xff] %v428_v32 }
  0xc9 PF: >> { %s443_s14 = sadd.s32 2, %s1239_s4 }
  0xca   : >> { %s444_s27 = sshra.s32 %s443_s14, 7  ;;  %s1387_s26 = sand.u32 127, %s443_s14 }
  0xcb   : >> { %s1389_s8 = sshll.u32 %s444_s27, 10  ;;  %s450_s15 = sadd.s32 128, %s1387_s26 }
  0xcc   : >> { %s1393_s28 = sadd.s32 2048, %s1389_s8  ;;  %s453_s16 = sadd.s32 256, %s1387_s26 }
  0xcd   : >> { %s451_s22 = sadd.s32 %s1393_s28, %s450_s15  ;;  %s454_s0 = sadd.s32 %s1393_s28, %s453_s16 }
  0xce   : >> { %s452_s18 = sld [smem:[#allocation2 + %s451_s22]]  ;;  %s456_s23 = sadd.s32 384, %s1387_s26 }
  0xcf   : >> { %s455_s21 = sld [smem:[#allocation2 + %s454_s0]]  ;;  %s457_s5 = sadd.s32 %s1393_s28, %s456_s23 }
  0xd0   : >> { %s459_s6 = sadd.s32 512, %s1387_s26  ;;  %s458_s13 = sld [smem:[#allocation2 + %s457_s5]] }
  0xd1   : >> { %s460_s7 = sadd.s32 %s1393_s28, %s459_s6 }
  0xd2   : >> { %s461_s10 = sld [smem:[#allocation2 + %s460_s7]] }
  0xd4   : >> { %p463_p1 = scmp.le.f32.partialorder %s452_s18, 127.0 }
  0xd5   : >> { %p462_p2 = scmp.ge.f32.partialorder %s455_s21, 0.0 }
  0xd6   : >> { %p469_p9 = scmp.le.f32.partialorder %s458_s13, %s1217_s25 }
  0xd7   : >> { %p464_p3 = pnand %p463_p1, %p462_p2 }
  0xd8   : >> { %p466_p4 = scmp.ge.f32.partialorder %s461_s10, %s1214_s24 }
  0xd9   : >> { %p465_p5 = pneg %p464_p3 }
  0xdb   : >> { %p467_p8 = pnand %p466_p4, %p465_p5 }
  0xdd   : >> { %p468_p10 = pneg %p467_p8 }
  0xdf   : >> { %p470_p11 = pnand %p469_p9, %p468_p10 }
  0xe0   : >> { %s475_s17 = sadd.s32 (!%p470_p11), %s1389_s8, %s1387_s26  ;;  %s477_s14 = sadd.s32 (!%p470_p11), %s1389_s8, %s450_s15 }
  0xe1   : >> { %473 = sbr.rel (%p470_p11) target bundleno = 283 (0x11b), region = 35  ;;  %s476_s27 = sld [smem:[#allocation2 + %s475_s17]] (!%p470_p11) }
  0xe2   : >> { %s479_s22 = sadd.s32 (!%p470_p11), %s1389_s8, %s453_s16  ;;  %s478_s0 = sld [smem:[#allocation2 + %s477_s14]] (!%p470_p11) }
  0xe3   : >> { %s481_s18 = sadd.s32 (!%p470_p11), %s1389_s8, %s456_s23  ;;  %s480_s21 = sld [smem:[#allocation2 + %s479_s22]] (!%p470_p11) }
  0xe4   : >> { %s483_s5 = sadd.s32 (!%p470_p11), %s1389_s8, %s459_s6  ;;  %s482_s7 = sld [smem:[#allocation2 + %s481_s18]] (!%p470_p11) }
  0xe5   : >> { %s484_s10 = sld [smem:[#allocation2 + %s483_s5]] (!%p470_p11)  ;;  %s485_s15 = sadd.s32 (!%p470_p11), 640, %s1387_s26 }
  0xe6   : >> { %s486_s16 = sadd.s32 %s1389_s8, %s485_s15  ;;  %s488_s6 = sadd.s32 768, %s1387_s26  ;;  %v534_v1 = vld [vmem:[#allocation4] sm:$0xff]  ;;  %v535_v5 = vld [vmem:[#allocation4 + $0x8] sm:$0xff]  ;;  %v554_v21 = vld [vmem:[#allocation5 + $0x8] sm:$0xff]  ;;  %vm1139_vm4 = vmmov 1  }
  0xe7   : >> { %v496_v34 = vstv %s476_s27  ;;  %s487_s23 = sld [smem:[#allocation2 + %s486_s16]]  ;;  %s491_s13 = sadd.s32 896, %s1387_s26  ;;  %v536_v3 = vld [vmem:[#allocation8] sm:$0xff]  ;;  %v537_v6 = vld [vmem:[#allocation8 + $0x8] sm:$0xff]  ;;  %v572_v27 = vld [vmem:[#allocation7] sm:$0xff] }
  0xe8   : >> { %v497_v35 = vsub.f32 %v1220_v8, %v496_v34  ;;  %v498_v36 = vstv %s478_s0  ;;  %s489_s17 = sadd.s32 %s1389_s8, %s488_s6  ;;  %s492_s14 = sadd.s32 %s1389_s8, %s491_s13  ;;  %vm546_vm11 = vcmp.gt.f32.partialorder %v536_v3, 0.0  ;;  %vm547_vm14 = vcmp.gt.f32.partialorder %v537_v6, 0.0  ;;  %v563_v22 = vld [vmem:[#allocation6 + $0x8] sm:$0xff]  ;;  %v555_v30 = vld [vmem:[#allocation5] sm:$0xff]  ;;  %v564_v31 = vld [vmem:[#allocation6] sm:$0xff] }
  0xe9   : >> { %v499_v37 = vsub.f32 %v1225_v10, %v498_v36  ;;  %v501_v38 = vstv %s480_s21  ;;  %v500_v39 = vsub.f32 %v1227_v11, %v498_v36  ;;  %s494_s27 = sadd.s32 %s1393_s28, %s1387_s26  ;;  %s1421_s22 = sld [smem:[#allocation2 + %s489_s17]] }
  0xea   : >> { %v502_v40 = vmul.f32 %v501_v38, %v497_v35  ;;  %v513_v41 = vstv %s482_s7  ;;  %s1423_s0 = sld [smem:[#allocation2 + %s492_s14]] }
  0xeb   : >> { %v504_v42 = vstv %s484_s10  ;;  %v514_v45 = vmul.f32 %v513_v41, %v497_v35  ;;  %s1425_s18 = sld [smem:[#allocation2 + %s494_s27]] }
  0xec   : >> { %v503_v43 = vmul.f32 %v502_v40, %v497_v35  ;;  %v505_v44 = vmul.f32 %v504_v42, %v499_v37  ;;  %v506_v46 = vmul.f32 %v504_v42, %v500_v39 }
  0xed   : >> { %v515_v50 = vmul.f32 %v514_v45, %v499_v37  ;;  %v516_v52 = vmul.f32 %v514_v45, %v500_v39  ;;  %v523_v59 = vstv %s487_s23 }
  0xee   : >> { %v507_v47 = vmul.f32 %v505_v44, %v499_v37  ;;  %v508_v48 = vmul.f32 %v506_v46, %v500_v39  ;;  %v573_v37 = vld [vmem:[#allocation7 + $0x8] sm:$0xff] }
  0xef   : >> { %v556_v15 = vstv %s1421_s22 }
  0xf0   : >> { %v509_v49 = vadd.f32 %v507_v47, %v503_v43  ;;  %v510_v51 = vadd.f32 %v508_v48, %v503_v43  ;;  %v565_v18 = vstv %s1423_s0 }
  0xf1   : >> { %v574_v19 = vstv %s1425_s18 }
  0xf2   : >> { %v511_v53 = vmul.f32 -0.5, %v509_v49  ;;  %v512_v54 = vmul.f32 -0.5, %v510_v51 }
  0xf4   : >> { %v517_v55 = vsub.f32 %v511_v53, %v515_v50  ;;  %v518_v56 = vsub.f32 %v512_v54, %v516_v52 }
  0xf6   : >> { %v519_v57 = vmul.f32 1.442695, %v517_v55  ;;  %v521_v58 = vmul.f32 1.442695, %v518_v56  ;;  %vm528_vm6 = vcmp.le.f32.partialorder %v517_v55, 0.0  ;;  %vm529_vm8 = vcmp.le.f32.partialorder %v518_v56, 0.0 }
  0xf8   : >> { %1042 = vpow2.f32 %v519_v57 }
  0xf9   : >> { %1044 = vpow2.f32 %v521_v58 }
 0x105   : >> { %v1043_v60 = vpop.eup %1042 }
 0x106   : >> { %v1045_v61 = vpop.eup %1044  ;;  %v524_v62 = vmul.f32 %v1043_v60, %v523_v59 }
 0x107   : >> { %v525_v63 = vmul.f32 %v1045_v61, %v523_v59 }
 0x108   : >> { %v526_v0 = vmin.f32 %v524_v62, 0.99 }
 0x109   : >> { %v527_v2 = vmin.f32 %v525_v63, 0.99 }
 0x10a   : >> { %vm530_vm7 = vcmp.ge.f32.partialorder %v526_v0, 0.003921569  ;;  %v538_v4 = vsub.f32 1.0, %v526_v0  ;;  %v550_v13 = vmul.f32 %v534_v1, %v526_v0 }
 0x10b   : >> { %vm531_vm9 = vcmp.ge.f32.partialorder %v527_v2, 0.003921569  ;;  %v539_v7 = vsub.f32 1.0, %v527_v2  ;;  %vm1427_vm10 = vmand %vm528_vm6, %vm530_vm7  ;;  %v551_v17 = vmul.f32 %v535_v5, %v527_v2 }
 0x10c   : >> { %v540_v12 = vmul.f32 %v538_v4, %v534_v1  ;;  %vm1432_vm13 = vmand %vm529_vm8, %vm531_vm9 }
 0x10d   : >> { %v541_v14 = vmul.f32 %v539_v7, %v535_v5 }
 0x10e   : >> { %vm542_vm12 = vcmp.ge.f32.partialorder %v540_v12, 0.0001 }
 0x10f   : >> { %vm544_vm15 = vmand %vm1427_vm10, %vm542_vm12  ;;  %vm543_vm0 = vcmp.ge.f32.partialorder %v541_v14, 0.0001 }
 0x110   : >> { %vm548_vm1 = vmand %vm544_vm15, %vm546_vm11 }
 0x111   : >> { %v552_v20 = vsel %vm548_vm1, %v550_v13, 0.0  ;;  %vm545_vm2 = vmand %vm1432_vm13, %vm543_vm0  ;;  %v581_v23 = vsel %vm548_vm1, %v540_v12, %v534_v1 }
 0x112   : >> { %v557_v24 = vmul.f32 %v556_v15, %v552_v20  ;;  %vm1444_vm3 = vmand %vm545_vm2, %vm547_vm14  ;;  %v566_v26 = vmul.f32 %v565_v18, %v552_v20  ;;  %v575_v28 = vmul.f32 %v574_v19, %v552_v20  ;;  %583 = vst [vmem:[#allocation4] sm:$0xff] %v581_v23 }
 0x113   : >> { %v553_v29 = vsel %vm1444_vm3, %v551_v17, 0.0  ;;  %v582_v32 = vsel %vm1444_vm3, %v541_v14, %v535_v5  ;;  %vm585_vm5 = vmxor %vm542_vm12, %vm1139_vm4 }
 0x114   : >> { %v559_v33 = vadd.f32 %v557_v24, %v554_v21  ;;  %v558_v34 = vmul.f32 %v556_v15, %v553_v29  ;;  %v568_v35 = vadd.f32 %v566_v26, %v563_v22  ;;  %v567_v36 = vmul.f32 %v565_v18, %v553_v29  ;;  %584 = vst [vmem:[#allocation4 + $0x8] sm:$0xff] %v582_v32  ;;  %vm587_vm6 = vmand %vm1427_vm10, %vm585_vm5 }
 0x115   : >> { %v577_v38 = vadd.f32 %v575_v28, %v572_v27  ;;  %v576_v39 = vmul.f32 %v574_v19, %v553_v29  ;;  %v589_v40 = vsel %vm587_vm6, 0.0, %v536_v3  ;;  %vm586_vm7 = vmxor %vm543_vm0, %vm1139_vm4 }
 0x116   : >> { %561 = vst [vmem:[#allocation5 + $0x8] sm:$0xff] %v559_v33  ;;  %v560_v41 = vadd.f32 %v558_v34, %v555_v30  ;;  %570 = vst [vmem:[#allocation6 + $0x8] sm:$0xff] %v568_v35  ;;  %v569_v42 = vadd.f32 %v567_v36, %v564_v31 }
 0x117   : >> { %591 = vst [vmem:[#allocation8] sm:$0xff] %v589_v40  ;;  %vm588_vm8 = vmand %vm1432_vm13, %vm586_vm7  ;;  %v578_v43 = vadd.f32 %v576_v39, %v573_v37 }
 0x118   : >> { %579 = vst [vmem:[#allocation7] sm:$0xff] %v577_v38  ;;  %v590_v44 = vsel %vm588_vm8, 0.0, %v537_v6  ;;  %562 = vst [vmem:[#allocation5] sm:$0xff] %v560_v41 }
 0x119   : >> { %571 = vst [vmem:[#allocation6] sm:$0xff] %v569_v42  ;;  %592 = vst [vmem:[#allocation8 + $0x8] sm:$0xff] %v590_v44 }
 0x11a   : >> { %580 = vst [vmem:[#allocation7 + $0x8] sm:$0xff] %v578_v43 }
 0x11b PF: >> { %s593_s26 = sadd.s32 3, %s1239_s4 }
 0x11c   : >> { %s594_s8 = sshra.s32 %s593_s26, 7  ;;  %s1459_s28 = sand.u32 127, %s593_s26 }
 0x11d   : >> { %s1461_s21 = sshll.u32 %s594_s8, 10  ;;  %s600_s5 = sadd.s32 128, %s1459_s28 }
 0x11e   : >> { %s1465_s7 = sadd.s32 2048, %s1461_s21  ;;  %s603_s10 = sadd.s32 256, %s1459_s28 }
 0x11f   : >> { %s601_s4 = sadd.s32 %s1465_s7, %s600_s5  ;;  %s604_s15 = sadd.s32 %s1465_s7, %s603_s10 }
 0x120   : >> { %s602_s16 = sld [smem:[#allocation2 + %s601_s4]]  ;;  %s606_s23 = sadd.s32 384, %s1459_s28 }
 0x121   : >> { %s605_s6 = sld [smem:[#allocation2 + %s604_s15]]  ;;  %s607_s13 = sadd.s32 %s1465_s7, %s606_s23 }
 0x122   : >> { %s609_s17 = sadd.s32 512, %s1459_s28  ;;  %s608_s22 = sld [smem:[#allocation2 + %s607_s13]] }
 0x123   : >> { %s610_s14 = sadd.s32 %s1465_s7, %s609_s17 }
 0x124   : >> { %s611_s27 = sld [smem:[#allocation2 + %s610_s14]] }
 0x126   : >> { %p613_p12 = scmp.le.f32.partialorder %s602_s16, 127.0 }
 0x127   : >> { %p612_p13 = scmp.ge.f32.partialorder %s605_s6, 0.0 }
 0x128   : >> { %p619_p4 = scmp.le.f32.partialorder %s608_s22, %s1217_s25 }
 0x129   : >> { %p614_p0 = pnand %p613_p12, %p612_p13 }
 0x12a   : >> { %p616_p1 = scmp.ge.f32.partialorder %s611_s27, %s1214_s24 }
 0x12b   : >> { %p615_p2 = pneg %p614_p0 }
 0x12d   : >> { %p617_p3 = pnand %p616_p1, %p615_p2 }
 0x12f   : >> { %p618_p5 = pneg %p617_p3 }
 0x131   : >> { %p620_p8 = pnand %p619_p4, %p618_p5 }
 0x132   : >> { %s625_s0 = sadd.s32 (!%p620_p8), %s1461_s21, %s1459_s28  ;;  %s627_s18 = sadd.s32 (!%p620_p8), %s1461_s21, %s600_s5 }
 0x133   : >> { %623 = sbr.rel (%p620_p8) target bundleno = 365 (0x16d), region = 39  ;;  %s626_s26 = sld [smem:[#allocation2 + %s625_s0]] (!%p620_p8) }
 0x134   : >> { %s629_s8 = sadd.s32 (!%p620_p8), %s1461_s21, %s603_s10  ;;  %s628_s4 = sld [smem:[#allocation2 + %s627_s18]] (!%p620_p8) }
 0x135   : >> { %s631_s15 = sadd.s32 (!%p620_p8), %s1461_s21, %s606_s23  ;;  %s630_s16 = sld [smem:[#allocation2 + %s629_s8]] (!%p620_p8) }
 0x136   : >> { %s633_s6 = sadd.s32 (!%p620_p8), %s1461_s21, %s609_s17  ;;  %s632_s13 = sld [smem:[#allocation2 + %s631_s15]] (!%p620_p8) }
 0x137   : >> { %s634_s14 = sld [smem:[#allocation2 + %s633_s6]] (!%p620_p8)  ;;  %s635_s5 = sadd.s32 (!%p620_p8), 640, %s1459_s28 }
 0x138   : >> { %s636_s10 = sadd.s32 %s1461_s21, %s635_s5  ;;  %s638_s17 = sadd.s32 768, %s1459_s28  ;;  %v684_v15 = vld [vmem:[#allocation4] sm:$0xff]  ;;  %v685_v19 = vld [vmem:[#allocation4 + $0x8] sm:$0xff]  ;;  %v704_v32 = vld [vmem:[#allocation5 + $0x8] sm:$0xff]  ;;  %vm1140_vm7 = vmmov 1  }
 0x139   : >> { %v646_v45 = vstv %s626_s26  ;;  %s637_s23 = sld [smem:[#allocation2 + %s636_s10]]  ;;  %s641_s27 = sadd.s32 896, %s1459_s28  ;;  %v686_v17 = vld [vmem:[#allocation8] sm:$0xff]  ;;  %v687_v20 = vld [vmem:[#allocation8 + $0x8] sm:$0xff]  ;;  %v722_v38 = vld [vmem:[#allocation7] sm:$0xff] }
 0x13a   : >> { %v647_v46 = vsub.f32 %v1220_v8, %v646_v45  ;;  %v648_v47 = vstv %s628_s4  ;;  %s639_s22 = sadd.s32 %s1461_s21, %s638_s17  ;;  %s642_s0 = sadd.s32 %s1461_s21, %s641_s27  ;;  %vm696_vm14 = vcmp.gt.f32.partialorder %v686_v17, 0.0  ;;  %vm697_vm1 = vcmp.gt.f32.partialorder %v687_v20, 0.0  ;;  %v713_v33 = vld [vmem:[#allocation6 + $0x8] sm:$0xff]  ;;  %v705_v41 = vld [vmem:[#allocation5] sm:$0xff]  ;;  %v714_v42 = vld [vmem:[#allocation6] sm:$0xff] }
 0x13b   : >> { %v649_v48 = vsub.f32 %v1225_v10, %v648_v47  ;;  %v651_v49 = vstv %s630_s16  ;;  %v650_v50 = vsub.f32 %v1227_v11, %v648_v47  ;;  %s644_s18 = sadd.s32 %s1465_s7, %s1459_s28  ;;  %s1493_s26 = sld [smem:[#allocation2 + %s639_s22]] }
 0x13c   : >> { %v652_v51 = vmul.f32 %v651_v49, %v647_v46  ;;  %v663_v52 = vstv %s632_s13  ;;  %s1495_s8 = sld [smem:[#allocation2 + %s642_s0]] }
 0x13d   : >> { %v654_v53 = vstv %s634_s14  ;;  %v664_v56 = vmul.f32 %v663_v52, %v647_v46  ;;  %s1497_s4 = sld [smem:[#allocation2 + %s644_s18]] }
 0x13e   : >> { %v653_v54 = vmul.f32 %v652_v51, %v647_v46  ;;  %v655_v55 = vmul.f32 %v654_v53, %v649_v48  ;;  %v656_v57 = vmul.f32 %v654_v53, %v650_v50 }
 0x13f   : >> { %v665_v61 = vmul.f32 %v664_v56, %v649_v48  ;;  %v666_v63 = vmul.f32 %v664_v56, %v650_v50  ;;  %v673_v6 = vstv %s637_s23 }
 0x140   : >> { %v657_v58 = vmul.f32 %v655_v55, %v649_v48  ;;  %v658_v59 = vmul.f32 %v656_v57, %v650_v50  ;;  %v723_v48 = vld [vmem:[#allocation7 + $0x8] sm:$0xff] }
 0x141   : >> { %v706_v26 = vstv %s1493_s26 }
 0x142   : >> { %v659_v60 = vadd.f32 %v657_v58, %v653_v54  ;;  %v660_v62 = vadd.f32 %v658_v59, %v653_v54  ;;  %v715_v29 = vstv %s1495_s8 }
 0x143   : >> { %v724_v30 = vstv %s1497_s4 }
 0x144   : >> { %v661_v0 = vmul.f32 -0.5, %v659_v60  ;;  %v662_v1 = vmul.f32 -0.5, %v660_v62 }
 0x146   : >> { %v667_v2 = vsub.f32 %v661_v0, %v665_v61  ;;  %v668_v3 = vsub.f32 %v662_v1, %v666_v63 }
 0x148   : >> { %v669_v4 = vmul.f32 1.442695, %v667_v2  ;;  %v671_v5 = vmul.f32 1.442695, %v668_v3  ;;  %vm678_vm9 = vcmp.le.f32.partialorder %v667_v2, 0.0  ;;  %vm679_vm11 = vcmp.le.f32.partialorder %v668_v3, 0.0 }
 0x14a   : >> { %1046 = vpow2.f32 %v669_v4 }
 0x14b   : >> { %1048 = vpow2.f32 %v671_v5 }
 0x157   : >> { %v1047_v7 = vpop.eup %1046 }
 0x158   : >> { %v1049_v9 = vpop.eup %1048  ;;  %v674_v12 = vmul.f32 %v1047_v7, %v673_v6 }
 0x159   : >> { %v675_v13 = vmul.f32 %v1049_v9, %v673_v6 }
 0x15a   : >> { %v676_v14 = vmin.f32 %v674_v12, 0.99 }
 0x15b   : >> { %v677_v16 = vmin.f32 %v675_v13, 0.99 }
 0x15c   : >> { %vm680_vm10 = vcmp.ge.f32.partialorder %v676_v14, 0.003921569  ;;  %v688_v18 = vsub.f32 1.0, %v676_v14  ;;  %v700_v24 = vmul.f32 %v684_v15, %v676_v14 }
 0x15d   : >> { %vm681_vm12 = vcmp.ge.f32.partialorder %v677_v16, 0.003921569  ;;  %v689_v21 = vsub.f32 1.0, %v677_v16  ;;  %vm1499_vm13 = vmand %vm678_vm9, %vm680_vm10  ;;  %v701_v28 = vmul.f32 %v685_v19, %v677_v16 }
 0x15e   : >> { %v690_v23 = vmul.f32 %v688_v18, %v684_v15  ;;  %vm1504_vm0 = vmand %vm679_vm11, %vm681_vm12 }
 0x15f   : >> { %v691_v25 = vmul.f32 %v689_v21, %v685_v19 }
 0x160   : >> { %vm692_vm15 = vcmp.ge.f32.partialorder %v690_v23, 0.0001 }
 0x161   : >> { %vm694_vm2 = vmand %vm1499_vm13, %vm692_vm15  ;;  %vm693_vm3 = vcmp.ge.f32.partialorder %v691_v25, 0.0001 }
 0x162   : >> { %vm698_vm4 = vmand %vm694_vm2, %vm696_vm14 }
 0x163   : >> { %v702_v31 = vsel %vm698_vm4, %v700_v24, 0.0  ;;  %vm695_vm5 = vmand %vm1504_vm0, %vm693_vm3  ;;  %v731_v34 = vsel %vm698_vm4, %v690_v23, %v684_v15 }
 0x164   : >> { %v707_v35 = vmul.f32 %v706_v26, %v702_v31  ;;  %vm1516_vm6 = vmand %vm695_vm5, %vm697_vm1  ;;  %v716_v37 = vmul.f32 %v715_v29, %v702_v31  ;;  %v725_v39 = vmul.f32 %v724_v30, %v702_v31  ;;  %733 = vst [vmem:[#allocation4] sm:$0xff] %v731_v34 }
 0x165   : >> { %v703_v40 = vsel %vm1516_vm6, %v701_v28, 0.0  ;;  %v732_v43 = vsel %vm1516_vm6, %v691_v25, %v685_v19  ;;  %vm735_vm8 = vmxor %vm692_vm15, %vm1140_vm7 }
 0x166   : >> { %v709_v44 = vadd.f32 %v707_v35, %v704_v32  ;;  %v708_v45 = vmul.f32 %v706_v26, %v703_v40  ;;  %v718_v46 = vadd.f32 %v716_v37, %v713_v33  ;;  %v717_v47 = vmul.f32 %v715_v29, %v703_v40  ;;  %734 = vst [vmem:[#allocation4 + $0x8] sm:$0xff] %v732_v43  ;;  %vm737_vm9 = vmand %vm1499_vm13, %vm735_vm8 }
 0x167   : >> { %v727_v49 = vadd.f32 %v725_v39, %v722_v38  ;;  %v726_v50 = vmul.f32 %v724_v30, %v703_v40  ;;  %v739_v51 = vsel %vm737_vm9, 0.0, %v686_v17  ;;  %vm736_vm10 = vmxor %vm693_vm3, %vm1140_vm7 }
 0x168   : >> { %711 = vst [vmem:[#allocation5 + $0x8] sm:$0xff] %v709_v44  ;;  %v710_v52 = vadd.f32 %v708_v45, %v705_v41  ;;  %720 = vst [vmem:[#allocation6 + $0x8] sm:$0xff] %v718_v46  ;;  %v719_v53 = vadd.f32 %v717_v47, %v714_v42 }
 0x169   : >> { %741 = vst [vmem:[#allocation8] sm:$0xff] %v739_v51  ;;  %vm738_vm11 = vmand %vm1504_vm0, %vm736_vm10  ;;  %v728_v54 = vadd.f32 %v726_v50, %v723_v48 }
 0x16a   : >> { %729 = vst [vmem:[#allocation7] sm:$0xff] %v727_v49  ;;  %v740_v55 = vsel %vm738_vm11, 0.0, %v687_v20  ;;  %712 = vst [vmem:[#allocation5] sm:$0xff] %v710_v52 }
 0x16b   : >> { %721 = vst [vmem:[#allocation6] sm:$0xff] %v719_v53  ;;  %742 = vst [vmem:[#allocation8 + $0x8] sm:$0xff] %v740_v55 }
 0x16c   : >> { %730 = vst [vmem:[#allocation7 + $0x8] sm:$0xff] %v728_v54 }
 0x16d PF: >> { %s142_s3 = sadd.s32 1, %s1132_s3  }
 0x16e   : >> { %p139_p9 = scmp.ge.s32.totalorder %s142_s3, 64  }
 0x16f   : > { %v743_v56 = vld [vmem:[#allocation5 + $0x8] sm:$0xff] (%p139_p9)  ;;  %v747_v58 = vld [vmem:[#allocation6 + $0x8] sm:$0xff] (%p139_p9)  ;;  %v757_v8 = vld [vmem:[#allocation4] sm:$0xff] (%p139_p9)  ;;  %s762_s24 = scalar_lea.sflag (%p139_p9), [#allocation10], %s1209_s20  ;;  %s767_s25 = scalar_lea.sflag (%p139_p9), [#allocation12], %s1209_s20 }
 0x170   : > { %141 = sbr.rel (!%p139_p9) target bundleno = 37 (0x25), region = 96  ;;  %745 = vst [vmem:[%s1229_s29] sm:$0xff] (%p139_p9), %v743_v56  ;;  %936 = vst [vmem:[%s1229_s29 + $0x10] sm:$0xff] (%p139_p9), %v747_v58  ;;  %v758_v10 = vld [vmem:[#allocation4 + $0x8] sm:$0xff] (%p139_p9) }
 0x171   : > { %v744_v57 = vld [vmem:[#allocation5] sm:$0xff] (%p139_p9)  ;;  %759 = vst [vmem:[%s1231_s30] sm:$0xff] (%p139_p9), %v757_v8  ;;  %760 = vst [vmem:[%s1231_s30 + $0x8] sm:$0xff] (%p139_p9), %v758_v10 }
 0x172   : > { %746 = vst [vmem:[%s1229_s29 + $0x8] sm:$0xff] (%p139_p9), %v744_v57  ;;  %v748_v59 = vld [vmem:[#allocation6] sm:$0xff] (%p139_p9)  ;;  %v752_v60 = vld [vmem:[#allocation7] sm:$0xff] (%p139_p9) }
 0x173   : > { %v753_v61 = vld [vmem:[#allocation7 + $0x8] sm:$0xff] (%p139_p9)  ;;  %937 = vst [vmem:[%s1229_s29 + $0x18] sm:$0xff] (%p139_p9), %v748_v59  ;;  %938 = vst [vmem:[%s1229_s29 + $0x20] sm:$0xff] (%p139_p9), %v752_v60 }
 0x174   : > { %939 = vst [vmem:[%s1229_s29 + $0x28] sm:$0xff] (%p139_p9), %v753_v61 }
 0x175   : > { %s957_s3 = sshll.u32 %s1124_s11, 8  ;;  %s791_s28 = sshll.u32 %s1229_s29, 4  ;;  %s792_s28 = int_to_ptr.vmem [resolvable:$true] %s791_s28 }
 0x176   : > { %s780_s15 = scalar_lea.hbm %s1589_s1, %s957_s3  ;;  %s1141_s16 = smov 256  }
 0x177   : > { %960 = sst [smem:[#allocation18]] (%p1203_p7), %s1141_s16  ;;  %s1142_s6 = smov 512  }
 0x178   : > { %961 = sst [smem:[#allocation18 + $0x1]] (%p1203_p7), %s1142_s6  ;;  %s1143_s13 = smov 2  }
 0x179   : > { %962 = sst [smem:[#allocation18 + $0x2]] (%p1203_p7), %s1143_s13  ;;  %s1144_s14 = smov 128  }
 0x17a   : > { %963 = sst [smem:[#allocation18 + $0x3]] (%p1203_p7), %s1144_s14  ;;  %s1145_s11 = smov 8  }
 0x17b   : > { %964 = sst [smem:[#allocation18 + $0x4]] (%p1203_p7), %s1144_s14  ;;  %s1146_s29 = smov 131072  }
 0x17c   : > { %965 = sst [smem:[#allocation18 + $0x5]] (%p1203_p7), %s1145_s11  ;;  %s1147_s5 = smov 0  }
 0x17d   : > { %966 = dma.general (%p1203_p7), %s792_s28, 768, %s780_s15, %s762_s24, %s1146_s29, [#allocation18], %s1147_s5, 0  }
 0x17e   : > { %s820_s17 = scalar_lea.hbm %s1590_s2, %s957_s3  ;;  %s821_s27 = sshll.u32 %s1231_s30, 4  ;;  %s822_s27 = int_to_ptr.vmem [resolvable:$true] %s821_s27 }
 0x17f   : > { %s1058_s22 = scalar_lea.vmem %s822_s27, 256  ;;  %s1148_s0 = smov [#allocation11]  }
 0x180   : > { %p1059_p10 = scmp.ne.s32.totalorder %s822_s27, %s1058_s22  ;;  %s1062_s18 = sshll.u32 %s1148_s0, 4  ;;  %s1063_s18 = int_to_ptr.vmem [resolvable:$false] %s1062_s18 }
 0x181   : > { %s1064_s26 = scalar_lea.vmem %s1063_s18, 512  ;;  %p1065_p13 = scmp.lt.s32.totalorder %s822_s27, %s1063_s18 }
 0x182   : > { %p1060_p11 = pnand %p1059_p10, %p1203_p7  ;;  %p1066_p0 = scmp.lt.s32.totalorder %s1064_s26, %s1058_s22 }
 0x184   : > { %p1061_p12 = pneg %p1060_p11  ;;  %p1067_p1 = por %p1066_p0, %p1065_p13 }
 0x186   : > { %p1068_p2 = pnand %p1067_p1, %p1061_p12 }
 0x188   : > { %1071 = shalt.err (!%p1068_p2)
}
 0x189   : > { %s1149_s8 = smov 128   ;;  %s1150_s4 = smov 8  }
 0x18a   : > { %967 = dma.vmem_to_hbm [thread:$0]  (%p1203_p7), %s822_s27, 256, %s820_s17, %s767_s25, %s1149_s8, %s1149_s8, %s1150_s4  }
 0x18b PF: > { %p977_p3 = scmp.ge.s32.totalorder %s1128_s12, 1  ;;  %s836_s24 = sand.u32 1, %s1116_s9  }
 0x18c   : > { %s837_s3 = scalar_lea.sflag [#allocation10], %s836_s24 }
 0x18d   : > { %p971_p4 = pnand %p977_p3, %p1196_p6 }
 0x18f   : > { %p972_p5 = pneg %p971_p4 }
 0x191   : > { %1107 = dma.done.wait (%p972_p5), %s837_s3, 768  }
 0x192   : > { %1109 = vsyncadd (%p972_p5), %s837_s3, 4294966528  ;;  %s846_s28 = scalar_lea.sflag [#allocation12], %s836_s24 }
 0x193   : > { %1111 = dma.done.wait (%p972_p5), %s846_s28, 256  }
 0x194   : > { %1113 = vsyncadd (%p972_p5), %s846_s28, 4294967040  ;;  %s19_s12 = sadd.s32 1, %s1128_s12   ;;  %s1627_s9 = sld [smem:[#allocation22_spill]] }
 0x195   : > { %p16_p8 = scmp.ge.s32.totalorder %s19_s12, 3   ;;  %s1628_s10 = sld [smem:[#allocation25_spill]] }
 0x196   : > { %s1629_s11 = sld [smem:[#allocation23_spill]] }
 0x197   :  { %18 = sbr.rel (!%p16_p8) target bundleno = 7 (0x7), region = 107 }
 0x19c   :  { %851 = vsyncpa [#allocation10], 1 }
 0x19d   :  { %853 = vsyncpa [#allocation10 + $0x1], 1 }
 0x19e   :  { %854 = vsyncpa [#allocation12], 1 }
 0x19f   :  { %856 = vsyncpa [#allocation12 + $0x1], 1 }
 0x1a0   :  { %857 = vsyncmov [#allocation3] }
 0x1a3   :  { %s858_s19 = vpop.sfrf %857 }
 0x1a4   :  { %p947_p6 = scmp.ne.s32.totalorder %s858_s19, 0 }
 0x1a6   :  { %862 = shalt.err (%p947_p6)  }
 0x1a7   :  { %864 = vsyncmov [#allocation3 + $0x1] }
 0x1aa   :  { %s865_s20 = vpop.sfrf %864 }
 0x1ab   :  { %p948_p7 = scmp.ne.s32.totalorder %s865_s20, 0 }
 0x1ad   :  { %869 = shalt.err (%p948_p7)  }

</bundles_post_ra>
